<compile_context>
chip_gen: v5e
topology: v5e:2x2
jax: 0.10.0
libtpu: 0.0.40
codegen_flags: <defaults>
</compile_context>

<pallas_src>
import math
import functools

import jax
import jax.numpy as jnp
from jax.experimental import pallas as pl
from jax.experimental.pallas import tpu as pltpu

F32 = jnp.float32
NEG_BIG = -1e7       # masked-softmax fill (matches common RE2 implementations)
POOL_FILL = -1e30    # finite fill for masked max pooling (avoids -inf -> NaN)
EPS = 1e-20


def _gelu(x):
    # RE2 uses the tanh-approximation GeLU; jax.nn.gelu default matches it.
    return jax.nn.gelu(x)


# ---------------------------------------------------------------------------
# Fused per-block kernel: encoder -> concat -> alignment -> fusion
# (+ pooling & prediction in the last block).
# ---------------------------------------------------------------------------
def _block_kernel(*refs, bb, Sp, Sq, Din, hidden, num_layers, kernel_sizes,
                  temp, is_last):
    it = iter(refs)
    p_ref = next(it)
    h_ref = next(it)
    mp_ref = next(it)
    mh_ref = next(it)
    mh_row_ref = next(it)
    posp_ref = next(it)
    posh_ref = next(it)
    enc_w = [[(next(it), next(it)) for _ in kernel_sizes]
             for _ in range(num_layers)]
    w1, b1, w2, b2, w3, b3, wf, bf = (next(it) for _ in range(8))
    if is_last:
        pw1, pb1, pw2, pb2 = (next(it) for _ in range(4))
        logits_ref = next(it)
    else:
        op_ref = next(it)
        oh_ref = next(it)

    p_in = p_ref[...]                    # (bb, Sp, Din)
    h_in = h_ref[...]                    # (bb, Sq, Din)
    mp = mp_ref[...]                     # (bb, Sp, 1)
    mh = mh_ref[...]                     # (bb, Sq, 1)
    mh_row = mh_row_ref[...]             # (bb, 1, Sq)

    # -- Encoder: masked Conv1d ("same" padding) + GELU.  All K taps are
    #    concatenated along the lane axis so each layer is ONE MXU dot of
    #    contraction K*Cin instead of K small ones.  Shift-validity masks are
    #    hoisted out of the tap loop and are (N, 1), not (N, Cin).
    def run_encoder(x3, m3, pos3, S):
        N = bb * S
        m2 = m3.reshape(N, 1)
        pos = pos3.reshape(N, 1)          # position within each sequence
        shifts = sorted({t - (K - 1) // 2
                         for K in kernel_sizes for t in range(K)})
        ok = {s: (pos + s >= 0) & (pos + s < S) for s in shifts if s != 0}
        cur = x3.reshape(N, x3.shape[-1])
        for l in range(num_layers):
            xm = cur * m2
            outs = []
            for ki, K in enumerate(kernel_sizes):
                w_ref, b_ref = enc_w[l][ki]
                pad = (K - 1) // 2
                taps = []
                for t in range(K):
                    s = t - pad
                    if s == 0:
                        taps.append(xm)
                    else:
                        xs = pltpu.roll(xm, shift=(-s) % N, axis=0)
                        taps.append(jnp.where(ok[s], xs, 0.0))
                xt = taps[0] if K == 1 else jnp.concatenate(taps, axis=-1)
                y = (jnp.dot(xt, w_ref[...], preferred_element_type=F32)
                     + b_ref[...])
                outs.append(_gelu(y))
            cur = outs[0] if len(outs) == 1 else jnp.concatenate(outs, axis=-1)
        return cur.reshape(bb, S, hidden)

    enc_p = run_encoder(p_in, mp, posp_ref[...], Sp)
    enc_h = run_encoder(h_in, mh, posh_ref[...], Sq)
    pc = jnp.concatenate([enc_p, p_in], axis=-1)      # (bb, Sp, D)
    hc = jnp.concatenate([enc_h, h_in], axis=-1)      # (bb, Sq, D)
    D = hidden + Din

    # -- Masked identity alignment: ONE exp (shared max), both softmax
    #    normalizations derived from it; reciprocals on the EUP.
    attn = jnp.einsum('bpd,bqd->bpq', pc * temp, hc,
                      preferred_element_type=F32)     # (bb, Sp, Sq)
    valid = (mp > 0.0) & (mh_row > 0.0)
    attn = jnp.where(valid, attn, NEG_BIG)
    m = jnp.max(jnp.max(attn, axis=2, keepdims=True), axis=1, keepdims=True)
    e = jnp.exp(attn - m)
    inv_row = pl.reciprocal(jnp.sum(e, axis=2, keepdims=True) + EPS,
                            approx=True)              # (bb, Sp, 1)
    inv_col = pl.reciprocal(jnp.sum(e, axis=1, keepdims=True) + EPS,
                            approx=True)              # (bb, 1, Sq)
    al_p = jnp.einsum('bpq,bqd->bpd', e, hc,
                      preferred_element_type=F32) * inv_row
    attn_a = jnp.swapaxes(e * inv_col, 1, 2)          # explicit transpose
    al_h = jnp.einsum('bqp,bpd->bqd', attn_a, pc,
                      preferred_element_type=F32)

    # -- Full fusion, premise & hypothesis rows stacked into one slab.
    X = jnp.concatenate([pc.reshape(bb * Sp, D), hc.reshape(bb * Sq, D)],
                        axis=0)                       # (N, D)
    AL = jnp.concatenate([al_p.reshape(bb * Sp, D), al_h.reshape(bb * Sq, D)],
                         axis=0)

    def branch(v, w_ref, b_ref):
        u = jnp.concatenate([X, v], axis=-1)          # (N, 2D) lane-filling
        return _gelu(jnp.dot(u, w_ref[...], preferred_element_type=F32)
                     + b_ref[...])

    x1 = branch(AL, w1, b1)
    x2 = branch(X - AL, w2, b2)
    x3 = branch(X * AL, w3, b3)
    fused = _gelu(jnp.dot(jnp.concatenate([x1, x2, x3], axis=-1), wf[...],
                          preferred_element_type=F32) + bf[...])
    fp = fused[:bb * Sp].reshape(bb, Sp, hidden)
    fh = fused[bb * Sp:].reshape(bb, Sq, hidden)

    if not is_last:
        op_ref[...] = fp
        oh_ref[...] = fh
    else:
        # Masked max pooling + prediction MLP fused into the last block.
        pa = jnp.max(jnp.where(mp > 0.0, fp, POOL_FILL), axis=1)   # (bb, H)
        ph = jnp.max(jnp.where(mh > 0.0, fh, POOL_FILL), axis=1)
        feat = jnp.concatenate([pa, ph, pa - ph, pa * ph], axis=-1)  # (bb, 4H)
        z = _gelu(jnp.dot(feat, pw1[...], preferred_element_type=F32)
                  + pb1[...])
        logits_ref[...] = (jnp.dot(z, pw2[...], preferred_element_type=F32)
                           + pb2[...])


# ---------------------------------------------------------------------------
# Wrapper: one pallas_call per block; batch split over (up to) 2 parallel
# grid steps, weights mapped whole into VMEM.
# ---------------------------------------------------------------------------
def _batch_spec(shape, bb):
    n = len(shape)

    def idx(i):
        return (i,) + (0,) * (n - 1)

    return pl.BlockSpec((bb,) + tuple(shape[1:]), idx)


def _full_spec(shape):
    n = len(shape)

    def idx(i):
        return (0,) * n

    return pl.BlockSpec(tuple(shape), idx)


def run_block(p, h, mask_p, mask_h, mask_h_row, pos_p, pos_h, blk, is_last,
              pred=None):
    B, Sp, Din = p.shape
    Sq = h.shape[1]
    fus = blk['fusion']
    hidden = fus['b1'].shape[-1]
    n_splits = 2 if (B >= 2 and B % 2 == 0) else 1    # feed both v7x TCs
    bb = B // n_splits

    kernel_sizes = tuple(w.shape[0] for (w, _) in blk['enc'][0])
    enc_flat = []
    for layer in blk['enc']:
        for (w, b) in layer:
            enc_flat.append(w.reshape(-1, w.shape[-1]))   # (K*Cin, out)
            enc_flat.append(b)

    data_inputs = [p, h, mask_p, mask_h, mask_h_row, pos_p, pos_h]
    weight_inputs = enc_flat + [fus['w1'], fus['b1'], fus['w2'], fus['b2'],
                                fus['w3'], fus['b3'], fus['wf'], fus['bf']]
    if is_last:
        weight_inputs += [pred['w1'], pred['b1'], pred['w2'], pred['b2']]

    in_specs = ([_batch_spec(a.shape, bb) for a in data_inputs]
                + [_full_spec(a.shape) for a in weight_inputs])

    kern = functools.partial(
        _block_kernel, bb=bb, Sp=Sp, Sq=Sq, Din=Din, hidden=hidden,
        num_layers=len(blk['enc']), kernel_sizes=kernel_sizes,
        temp=blk['temp'], is_last=is_last)

    if is_last:
        C = pred['b2'].shape[-1]
        out_shape = jax.ShapeDtypeStruct((B, C), F32)
        out_specs = pl.BlockSpec((bb, C), lambda i: (i, 0))
    else:
        out_shape = (jax.ShapeDtypeStruct((B, Sp, hidden), F32),
                     jax.ShapeDtypeStruct((B, Sq, hidden), F32))
        out_specs = (pl.BlockSpec((bb, Sp, hidden), lambda i: (i, 0, 0)),
                     pl.BlockSpec((bb, Sq, hidden), lambda i: (i, 0, 0)))

    return pl.pallas_call(
        kern,
        out_shape=out_shape,
        grid=(n_splits,),
        in_specs=in_specs,
        out_specs=out_specs,
        compiler_params=pltpu.CompilerParams(
            dimension_semantics=("parallel",)),
    )(*data_inputs, *weight_inputs)


# ---------------------------------------------------------------------------
# Glue: augmented residual connection (plain JAX).
# ---------------------------------------------------------------------------
def augmented_connection(x, res, i):
    if i == 1:
        return jnp.concatenate([x, res], axis=-1)      # res = raw embedding
    hidden = x.shape[-1]
    return jnp.concatenate(
        [(res[..., :hidden] + x) * math.sqrt(0.5), res[..., hidden:]], axis=-1)


# ---------------------------------------------------------------------------
# Parameter init (deterministic, synthetic) and full forward.
# ---------------------------------------------------------------------------
def init_params(key, vocab_size, emb_dim, hidden, num_layers, kernel_sizes,
                num_blocks, num_feat_type, num_classes):
    keys = list(jax.random.split(key, 256))
    it = iter(keys)

    def nrm(shape, scale):
        return jax.random.normal(next(it), shape, F32) * scale

    params = {'embedding': nrm((vocab_size, emb_dim), 1.0), 'blocks': []}
    for i in range(num_blocks):
        in_feat = emb_dim if i == 0 else emb_dim + hidden
        enc_layers = []
        out_ch = hidden // len(kernel_sizes)
        for l in range(num_layers):
            cin = in_feat if l == 0 else hidden
            per_k = []
            for k in kernel_sizes:
                w = nrm((k, cin, out_ch), math.sqrt(2.0 / (cin * k)))
                b = jnp.zeros((1, out_ch), F32)
                per_k.append((w, b))
            enc_layers.append(per_k)
        align_dim = emb_dim + hidden if i == 0 else emb_dim + 2 * hidden
        fus = {
            'w1': nrm((2 * align_dim, hidden), math.sqrt(1.0 / (2 * align_dim))),
            'b1': jnp.zeros((1, hidden), F32),
            'w2': nrm((2 * align_dim, hidden), math.sqrt(1.0 / (2 * align_dim))),
            'b2': jnp.zeros((1, hidden), F32),
            'w3': nrm((2 * align_dim, hidden), math.sqrt(1.0 / (2 * align_dim))),
            'b3': jnp.zeros((1, hidden), F32),
            'wf': nrm((3 * hidden, hidden), math.sqrt(1.0 / (3 * hidden))),
            'bf': jnp.zeros((1, hidden), F32),
        }
        params['blocks'].append({
            'enc': enc_layers,
            'temp': 1.0 / math.sqrt(align_dim),   # identity-alignment temperature
            'fusion': fus,
        })
    params['pred'] = {
        'w1': nrm((num_feat_type * hidden, hidden),
                  math.sqrt(1.0 / (num_feat_type * hidden))),
        'b1': jnp.zeros((1, hidden), F32),
        'w2': nrm((hidden, num_classes), math.sqrt(1.0 / hidden)),
        'b2': jnp.zeros((1, num_classes), F32),
    }
    return params


def re2_forward(params, premise_tokens, hypothesis_tokens):
    B, Sp = premise_tokens.shape
    Sq = hypothesis_tokens.shape[1]
    mask_p = (premise_tokens != 0).astype(F32)[:, :, None]
    mask_h = (hypothesis_tokens != 0).astype(F32)[:, :, None]
    mask_h_row = jnp.transpose(mask_h, (0, 2, 1))
    pos_p = jnp.broadcast_to(jnp.arange(Sp, dtype=jnp.int32)[None, :, None],
                             (B, Sp, 1))
    pos_h = jnp.broadcast_to(jnp.arange(Sq, dtype=jnp.int32)[None, :, None],
                             (B, Sq, 1))
    # TODO(synk): embedding gather stays in plain JAX (jnp.take); dropout is
    # identity in eval mode.
    p = jnp.take(params['embedding'], premise_tokens, axis=0)
    h = jnp.take(params['embedding'], hypothesis_tokens, axis=0)
    prev_p, prev_h = p, h
    nb = len(params['blocks'])
    for i, blk in enumerate(params['blocks']):
        if i > 0:
            p = augmented_connection(p, prev_p, i)
            h = augmented_connection(h, prev_h, i)
            prev_p, prev_h = p, h
        is_last = (i == nb - 1)
        out = run_block(p, h, mask_p, mask_h, mask_h_row, pos_p, pos_h, blk,
                        is_last, pred=params['pred'] if is_last else None)
        if is_last:
            return out
        p, h = out


if __name__ == "__main__":
    # Small config consistent with RE2's __init__.
    vocab_size, emb_dim, hidden = 64, 32, 32
    num_layers, kernel_sizes, num_blocks = 2, (3,), 2
    num_feat_type, num_classes = 4, 3
    B, Sp, Sq = 2, 8, 8

    root = jax.random.PRNGKey(0)
    kp, kh, kw = jax.random.split(root, 3)
    premise = jax.random.randint(kp, (B, Sp), 1, vocab_size)
    hypothesis = jax.random.randint(kh, (B, Sq), 1, vocab_size)
    # Introduce some padding (token id 0) at the tail of a couple sequences.
    pos_p = jnp.arange(Sp)[None, :]
    pos_q = jnp.arange(Sq)[None, :]
    premise = jnp.where((jnp.arange(B)[:, None] == 1) & (pos_p >= 6), 0, premise)
    hypothesis = jnp.where((jnp.arange(B)[:, None] == 0) & (pos_q >= 5), 0, hypothesis)

    params = init_params(kw, vocab_size, emb_dim, hidden, num_layers,
                         kernel_sizes, num_blocks, num_feat_type, num_classes)

    logits = re2_forward(params, premise, hypothesis)
    logits = jax.block_until_ready(logits)
    assert logits.shape == (B, num_classes)
    assert bool(jnp.all(jnp.isfinite(logits)))
    print("KERNEL_OK")
</pallas_src>

<mosaic_0001>
module attributes {stable_mosaic.version = 11 : i64} {
  func.func @_block_kernel(%arg0: i32, %arg1: memref<1x8x32xf32, #tpu.memory_space<vmem>>, %arg2: memref<1x8x32xf32, #tpu.memory_space<vmem>>, %arg3: memref<1x8x1xf32, #tpu.memory_space<vmem>>, %arg4: memref<1x8x1xf32, #tpu.memory_space<vmem>>, %arg5: memref<1x1x8xf32, #tpu.memory_space<vmem>>, %arg6: memref<1x8x1xi32, #tpu.memory_space<vmem>>, %arg7: memref<1x8x1xi32, #tpu.memory_space<vmem>>, %arg8: memref<96x32xf32, #tpu.memory_space<vmem>>, %arg9: memref<1x32xf32, #tpu.memory_space<vmem>>, %arg10: memref<96x32xf32, #tpu.memory_space<vmem>>, %arg11: memref<1x32xf32, #tpu.memory_space<vmem>>, %arg12: memref<128x32xf32, #tpu.memory_space<vmem>>, %arg13: memref<1x32xf32, #tpu.memory_space<vmem>>, %arg14: memref<128x32xf32, #tpu.memory_space<vmem>>, %arg15: memref<1x32xf32, #tpu.memory_space<vmem>>, %arg16: memref<128x32xf32, #tpu.memory_space<vmem>>, %arg17: memref<1x32xf32, #tpu.memory_space<vmem>>, %arg18: memref<96x32xf32, #tpu.memory_space<vmem>>, %arg19: memref<1x32xf32, #tpu.memory_space<vmem>>, %arg20: memref<1x8x32xf32, #tpu.memory_space<vmem>>, %arg21: memref<1x8x32xf32, #tpu.memory_space<vmem>>) attributes {dimension_semantics = [#tpu.dimension_semantics<parallel>], iteration_bounds = array<i64: 2>, scalar_prefetch = 0 : i64, scratch_operands = 0 : i64, tpu.core_type = #tpu.core_type<tc>, window_params = [{transform_indices = @transform_0, window_bounds = array<i64: 1, 8, 32>}, {transform_indices = @transform_1, window_bounds = array<i64: 1, 8, 32>}, {transform_indices = @transform_2, window_bounds = array<i64: 1, 8, 1>}, {transform_indices = @transform_3, window_bounds = array<i64: 1, 8, 1>}, {transform_indices = @transform_4, window_bounds = array<i64: 1, 1, 8>}, {transform_indices = @transform_5, window_bounds = array<i64: 1, 8, 1>}, {transform_indices = @transform_6, window_bounds = array<i64: 1, 8, 1>}, {pipeline_mode = #tpu.pipeline_mode<synchronous>, transform_indices = @transform_7, window_bounds = array<i64: 96, 32>}, {pipeline_mode = #tpu.pipeline_mode<synchronous>, transform_indices = @transform_8, window_bounds = array<i64: 1, 32>}, {pipeline_mode = #tpu.pipeline_mode<synchronous>, transform_indices = @transform_9, window_bounds = array<i64: 96, 32>}, {pipeline_mode = #tpu.pipeline_mode<synchronous>, transform_indices = @transform_10, window_bounds = array<i64: 1, 32>}, {pipeline_mode = #tpu.pipeline_mode<synchronous>, transform_indices = @transform_11, window_bounds = array<i64: 128, 32>}, {pipeline_mode = #tpu.pipeline_mode<synchronous>, transform_indices = @transform_12, window_bounds = array<i64: 1, 32>}, {pipeline_mode = #tpu.pipeline_mode<synchronous>, transform_indices = @transform_13, window_bounds = array<i64: 128, 32>}, {pipeline_mode = #tpu.pipeline_mode<synchronous>, transform_indices = @transform_14, window_bounds = array<i64: 1, 32>}, {pipeline_mode = #tpu.pipeline_mode<synchronous>, transform_indices = @transform_15, window_bounds = array<i64: 128, 32>}, {pipeline_mode = #tpu.pipeline_mode<synchronous>, transform_indices = @transform_16, window_bounds = array<i64: 1, 32>}, {pipeline_mode = #tpu.pipeline_mode<synchronous>, transform_indices = @transform_17, window_bounds = array<i64: 96, 32>}, {pipeline_mode = #tpu.pipeline_mode<synchronous>, transform_indices = @transform_18, window_bounds = array<i64: 1, 32>}, {transform_indices = @transform_19, window_bounds = array<i64: 1, 8, 32>}, {transform_indices = @transform_20, window_bounds = array<i64: 1, 8, 32>}]} {
    %c0 = arith.constant 0 : index
    %c0_0 = arith.constant 0 : index
    %c0_1 = arith.constant 0 : index
    %0 = vector.load %arg1[%c0, %c0_0, %c0_1] : memref<1x8x32xf32, #tpu.memory_space<vmem>>, vector<1x8x32xf32>
    %c0_2 = arith.constant 0 : index
    %c0_3 = arith.constant 0 : index
    %c0_4 = arith.constant 0 : index
    %1 = vector.load %arg2[%c0_2, %c0_3, %c0_4] : memref<1x8x32xf32, #tpu.memory_space<vmem>>, vector<1x8x32xf32>
    %c0_5 = arith.constant 0 : index
    %c0_6 = arith.constant 0 : index
    %c0_7 = arith.constant 0 : index
    %2 = vector.load %arg3[%c0_5, %c0_6, %c0_7] : memref<1x8x1xf32, #tpu.memory_space<vmem>>, vector<1x8x1xf32>
    %c0_8 = arith.constant 0 : index
    %c0_9 = arith.constant 0 : index
    %c0_10 = arith.constant 0 : index
    %3 = vector.load %arg4[%c0_8, %c0_9, %c0_10] : memref<1x8x1xf32, #tpu.memory_space<vmem>>, vector<1x8x1xf32>
    %c0_11 = arith.constant 0 : index
    %c0_12 = arith.constant 0 : index
    %c0_13 = arith.constant 0 : index
    %4 = vector.load %arg5[%c0_11, %c0_12, %c0_13] : memref<1x1x8xf32, #tpu.memory_space<vmem>>, vector<1x1x8xf32>
    %c0_14 = arith.constant 0 : index
    %c0_15 = arith.constant 0 : index
    %c0_16 = arith.constant 0 : index
    %5 = vector.load %arg6[%c0_14, %c0_15, %c0_16] : memref<1x8x1xi32, #tpu.memory_space<vmem>>, vector<1x8x1xi32>
    %6 = vector.shape_cast %2 : vector<1x8x1xf32> to vector<8x1xf32>
    %7 = vector.shape_cast %5 : vector<1x8x1xi32> to vector<8x1xi32>
    %c-1_i32 = arith.constant -1 : i32
    %8 = vector.broadcast %c-1_i32 : i32 to vector<8x1xi32>
    %9 = arith.addi %7, %8 : vector<8x1xi32>
    %c0_i32 = arith.constant 0 : i32
    %10 = vector.broadcast %c0_i32 : i32 to vector<8x1xi32>
    %11 = arith.cmpi sge, %9, %10 : vector<8x1xi32>
    %c-1_i32_17 = arith.constant -1 : i32
    %12 = vector.broadcast %c-1_i32_17 : i32 to vector<8x1xi32>
    %13 = arith.addi %7, %12 : vector<8x1xi32>
    %c8_i32 = arith.constant 8 : i32
    %14 = vector.broadcast %c8_i32 : i32 to vector<8x1xi32>
    %15 = arith.cmpi slt, %13, %14 : vector<8x1xi32>
    %16 = arith.andi %11, %15 : vector<8x1xi1>
    %c1_i32 = arith.constant 1 : i32
    %17 = vector.broadcast %c1_i32 : i32 to vector<8x1xi32>
    %18 = arith.addi %7, %17 : vector<8x1xi32>
    %c0_i32_18 = arith.constant 0 : i32
    %19 = vector.broadcast %c0_i32_18 : i32 to vector<8x1xi32>
    %20 = arith.cmpi sge, %18, %19 : vector<8x1xi32>
    %c1_i32_19 = arith.constant 1 : i32
    %21 = vector.broadcast %c1_i32_19 : i32 to vector<8x1xi32>
    %22 = arith.addi %7, %21 : vector<8x1xi32>
    %c8_i32_20 = arith.constant 8 : i32
    %23 = vector.broadcast %c8_i32_20 : i32 to vector<8x1xi32>
    %24 = arith.cmpi slt, %22, %23 : vector<8x1xi32>
    %25 = arith.andi %20, %24 : vector<8x1xi1>
    %26 = vector.shape_cast %0 : vector<1x8x32xf32> to vector<8x32xf32>
    %27 = vector.broadcast %6 : vector<8x1xf32> to vector<8x32xf32>
    %28 = arith.mulf %26, %27 : vector<8x32xf32>
    %c1_i32_21 = arith.constant 1 : i32
    %29 = tpu.dynamic_rotate %28 by %c1_i32_21 dim 0 : vector<8x32xf32>, i32 -> vector<8x32xf32>
    %cst = arith.constant 0.000000e+00 : f32
    %30 = vector.shape_cast %16 : vector<8x1xi1> to vector<8x1xi1>
    %31 = vector.broadcast %30 : vector<8x1xi1> to vector<8x32xi1>
    %32 = vector.broadcast %cst : f32 to vector<8x32xf32>
    %33 = arith.select %31, %29, %32 : vector<8x32xi1>, vector<8x32xf32>
    %c7_i32 = arith.constant 7 : i32
    %34 = tpu.dynamic_rotate %28 by %c7_i32 dim 0 : vector<8x32xf32>, i32 -> vector<8x32xf32>
    %cst_22 = arith.constant 0.000000e+00 : f32
    %35 = vector.shape_cast %25 : vector<8x1xi1> to vector<8x1xi1>
    %36 = vector.broadcast %35 : vector<8x1xi1> to vector<8x32xi1>
    %37 = vector.broadcast %cst_22 : f32 to vector<8x32xf32>
    %38 = arith.select %36, %34, %37 : vector<8x32xi1>, vector<8x32xf32>
    %39 = tpu.concatenate %33, %28, %38 in 1 : vector<8x32xf32>, vector<8x32xf32>, vector<8x32xf32> -> vector<8x96xf32>
    %c0_23 = arith.constant 0 : index
    %c0_24 = arith.constant 0 : index
    %40 = vector.load %arg8[%c0_23, %c0_24] : memref<96x32xf32, #tpu.memory_space<vmem>>, vector<96x32xf32>
    %cst_25 = arith.constant dense<0.000000e+00> : vector<8x32xf32>
    %41 = tpu.matmul %39, %40, %cst_25 {dimension_numbers = #tpu.dot_dimension_numbers<[1], [0], [0], [1], [0, 0, 1, 1], [], []>} : vector<8x96xf32>, vector<96x32xf32>, vector<8x32xf32> -> vector<8x32xf32>
    %c0_26 = arith.constant 0 : index
    %c0_27 = arith.constant 0 : index
    %42 = vector.load %arg9[%c0_26, %c0_27] : memref<1x32xf32, #tpu.memory_space<vmem>>, vector<1x32xf32>
    %43 = vector.broadcast %42 : vector<1x32xf32> to vector<8x32xf32>
    %44 = arith.addf %41, %43 : vector<8x32xf32>
    %45 = arith.mulf %44, %44 : vector<8x32xf32>
    %46 = arith.mulf %44, %45 : vector<8x32xf32>
    %cst_28 = arith.constant 4.471500e-02 : f32
    %47 = vector.broadcast %cst_28 : f32 to vector<8x32xf32>
    %48 = arith.mulf %47, %46 : vector<8x32xf32>
    %49 = arith.addf %44, %48 : vector<8x32xf32>
    %cst_29 = arith.constant 0.797884583 : f32
    %50 = vector.broadcast %cst_29 : f32 to vector<8x32xf32>
    %51 = arith.mulf %50, %49 : vector<8x32xf32>
    %52 = math.tanh %51 : vector<8x32xf32>
    %cst_30 = arith.constant 1.000000e+00 : f32
    %53 = vector.broadcast %cst_30 : f32 to vector<8x32xf32>
    %54 = arith.addf %53, %52 : vector<8x32xf32>
    %cst_31 = arith.constant 5.000000e-01 : f32
    %55 = vector.broadcast %cst_31 : f32 to vector<8x32xf32>
    %56 = arith.mulf %55, %54 : vector<8x32xf32>
    %57 = arith.mulf %44, %56 : vector<8x32xf32>
    %58 = vector.broadcast %6 : vector<8x1xf32> to vector<8x32xf32>
    %59 = arith.mulf %57, %58 : vector<8x32xf32>
    %c1_i32_32 = arith.constant 1 : i32
    %60 = tpu.dynamic_rotate %59 by %c1_i32_32 dim 0 : vector<8x32xf32>, i32 -> vector<8x32xf32>
    %cst_33 = arith.constant 0.000000e+00 : f32
    %61 = vector.shape_cast %16 : vector<8x1xi1> to vector<8x1xi1>
    %62 = vector.broadcast %61 : vector<8x1xi1> to vector<8x32xi1>
    %63 = vector.broadcast %cst_33 : f32 to vector<8x32xf32>
    %64 = arith.select %62, %60, %63 : vector<8x32xi1>, vector<8x32xf32>
    %c7_i32_34 = arith.constant 7 : i32
    %65 = tpu.dynamic_rotate %59 by %c7_i32_34 dim 0 : vector<8x32xf32>, i32 -> vector<8x32xf32>
    %cst_35 = arith.constant 0.000000e+00 : f32
    %66 = vector.shape_cast %25 : vector<8x1xi1> to vector<8x1xi1>
    %67 = vector.broadcast %66 : vector<8x1xi1> to vector<8x32xi1>
    %68 = vector.broadcast %cst_35 : f32 to vector<8x32xf32>
    %69 = arith.select %67, %65, %68 : vector<8x32xi1>, vector<8x32xf32>
    %70 = tpu.concatenate %64, %59, %69 in 1 : vector<8x32xf32>, vector<8x32xf32>, vector<8x32xf32> -> vector<8x96xf32>
    %c0_36 = arith.constant 0 : index
    %c0_37 = arith.constant 0 : index
    %71 = vector.load %arg10[%c0_36, %c0_37] : memref<96x32xf32, #tpu.memory_space<vmem>>, vector<96x32xf32>
    %cst_38 = arith.constant dense<0.000000e+00> : vector<8x32xf32>
    %72 = tpu.matmul %70, %71, %cst_38 {dimension_numbers = #tpu.dot_dimension_numbers<[1], [0], [0], [1], [0, 0, 1, 1], [], []>} : vector<8x96xf32>, vector<96x32xf32>, vector<8x32xf32> -> vector<8x32xf32>
    %c0_39 = arith.constant 0 : index
    %c0_40 = arith.constant 0 : index
    %73 = vector.load %arg11[%c0_39, %c0_40] : memref<1x32xf32, #tpu.memory_space<vmem>>, vector<1x32xf32>
    %74 = vector.broadcast %73 : vector<1x32xf32> to vector<8x32xf32>
    %75 = arith.addf %72, %74 : vector<8x32xf32>
    %76 = arith.mulf %75, %75 : vector<8x32xf32>
    %77 = arith.mulf %75, %76 : vector<8x32xf32>
    %cst_41 = arith.constant 4.471500e-02 : f32
    %78 = vector.broadcast %cst_41 : f32 to vector<8x32xf32>
    %79 = arith.mulf %78, %77 : vector<8x32xf32>
    %80 = arith.addf %75, %79 : vector<8x32xf32>
    %cst_42 = arith.constant 0.797884583 : f32
    %81 = vector.broadcast %cst_42 : f32 to vector<8x32xf32>
    %82 = arith.mulf %81, %80 : vector<8x32xf32>
    %83 = math.tanh %82 : vector<8x32xf32>
    %cst_43 = arith.constant 1.000000e+00 : f32
    %84 = vector.broadcast %cst_43 : f32 to vector<8x32xf32>
    %85 = arith.addf %84, %83 : vector<8x32xf32>
    %cst_44 = arith.constant 5.000000e-01 : f32
    %86 = vector.broadcast %cst_44 : f32 to vector<8x32xf32>
    %87 = arith.mulf %86, %85 : vector<8x32xf32>
    %88 = arith.mulf %75, %87 : vector<8x32xf32>
    %89 = vector.shape_cast %88 : vector<8x32xf32> to vector<1x8x32xf32>
    %c0_45 = arith.constant 0 : index
    %c0_46 = arith.constant 0 : index
    %c0_47 = arith.constant 0 : index
    %90 = vector.load %arg7[%c0_45, %c0_46, %c0_47] : memref<1x8x1xi32, #tpu.memory_space<vmem>>, vector<1x8x1xi32>
    %91 = vector.shape_cast %3 : vector<1x8x1xf32> to vector<8x1xf32>
    %92 = vector.shape_cast %90 : vector<1x8x1xi32> to vector<8x1xi32>
    %c-1_i32_48 = arith.constant -1 : i32
    %93 = vector.broadcast %c-1_i32_48 : i32 to vector<8x1xi32>
    %94 = arith.addi %92, %93 : vector<8x1xi32>
    %c0_i32_49 = arith.constant 0 : i32
    %95 = vector.broadcast %c0_i32_49 : i32 to vector<8x1xi32>
    %96 = arith.cmpi sge, %94, %95 : vector<8x1xi32>
    %c-1_i32_50 = arith.constant -1 : i32
    %97 = vector.broadcast %c-1_i32_50 : i32 to vector<8x1xi32>
    %98 = arith.addi %92, %97 : vector<8x1xi32>
    %c8_i32_51 = arith.constant 8 : i32
    %99 = vector.broadcast %c8_i32_51 : i32 to vector<8x1xi32>
    %100 = arith.cmpi slt, %98, %99 : vector<8x1xi32>
    %101 = arith.andi %96, %100 : vector<8x1xi1>
    %c1_i32_52 = arith.constant 1 : i32
    %102 = vector.broadcast %c1_i32_52 : i32 to vector<8x1xi32>
    %103 = arith.addi %92, %102 : vector<8x1xi32>
    %c0_i32_53 = arith.constant 0 : i32
    %104 = vector.broadcast %c0_i32_53 : i32 to vector<8x1xi32>
    %105 = arith.cmpi sge, %103, %104 : vector<8x1xi32>
    %c1_i32_54 = arith.constant 1 : i32
    %106 = vector.broadcast %c1_i32_54 : i32 to vector<8x1xi32>
    %107 = arith.addi %92, %106 : vector<8x1xi32>
    %c8_i32_55 = arith.constant 8 : i32
    %108 = vector.broadcast %c8_i32_55 : i32 to vector<8x1xi32>
    %109 = arith.cmpi slt, %107, %108 : vector<8x1xi32>
    %110 = arith.andi %105, %109 : vector<8x1xi1>
    %111 = vector.shape_cast %1 : vector<1x8x32xf32> to vector<8x32xf32>
    %112 = vector.broadcast %91 : vector<8x1xf32> to vector<8x32xf32>
    %113 = arith.mulf %111, %112 : vector<8x32xf32>
    %c1_i32_56 = arith.constant 1 : i32
    %114 = tpu.dynamic_rotate %113 by %c1_i32_56 dim 0 : vector<8x32xf32>, i32 -> vector<8x32xf32>
    %cst_57 = arith.constant 0.000000e+00 : f32
    %115 = vector.shape_cast %101 : vector<8x1xi1> to vector<8x1xi1>
    %116 = vector.broadcast %115 : vector<8x1xi1> to vector<8x32xi1>
    %117 = vector.broadcast %cst_57 : f32 to vector<8x32xf32>
    %118 = arith.select %116, %114, %117 : vector<8x32xi1>, vector<8x32xf32>
    %c7_i32_58 = arith.constant 7 : i32
    %119 = tpu.dynamic_rotate %113 by %c7_i32_58 dim 0 : vector<8x32xf32>, i32 -> vector<8x32xf32>
    %cst_59 = arith.constant 0.000000e+00 : f32
    %120 = vector.shape_cast %110 : vector<8x1xi1> to vector<8x1xi1>
    %121 = vector.broadcast %120 : vector<8x1xi1> to vector<8x32xi1>
    %122 = vector.broadcast %cst_59 : f32 to vector<8x32xf32>
    %123 = arith.select %121, %119, %122 : vector<8x32xi1>, vector<8x32xf32>
    %124 = tpu.concatenate %118, %113, %123 in 1 : vector<8x32xf32>, vector<8x32xf32>, vector<8x32xf32> -> vector<8x96xf32>
    %c0_60 = arith.constant 0 : index
    %c0_61 = arith.constant 0 : index
    %125 = vector.load %arg8[%c0_60, %c0_61] : memref<96x32xf32, #tpu.memory_space<vmem>>, vector<96x32xf32>
    %cst_62 = arith.constant dense<0.000000e+00> : vector<8x32xf32>
    %126 = tpu.matmul %124, %125, %cst_62 {dimension_numbers = #tpu.dot_dimension_numbers<[1], [0], [0], [1], [0, 0, 1, 1], [], []>} : vector<8x96xf32>, vector<96x32xf32>, vector<8x32xf32> -> vector<8x32xf32>
    %c0_63 = arith.constant 0 : index
    %c0_64 = arith.constant 0 : index
    %127 = vector.load %arg9[%c0_63, %c0_64] : memref<1x32xf32, #tpu.memory_space<vmem>>, vector<1x32xf32>
    %128 = vector.broadcast %127 : vector<1x32xf32> to vector<8x32xf32>
    %129 = arith.addf %126, %128 : vector<8x32xf32>
    %130 = arith.mulf %129, %129 : vector<8x32xf32>
    %131 = arith.mulf %129, %130 : vector<8x32xf32>
    %cst_65 = arith.constant 4.471500e-02 : f32
    %132 = vector.broadcast %cst_65 : f32 to vector<8x32xf32>
    %133 = arith.mulf %132, %131 : vector<8x32xf32>
    %134 = arith.addf %129, %133 : vector<8x32xf32>
    %cst_66 = arith.constant 0.797884583 : f32
    %135 = vector.broadcast %cst_66 : f32 to vector<8x32xf32>
    %136 = arith.mulf %135, %134 : vector<8x32xf32>
    %137 = math.tanh %136 : vector<8x32xf32>
    %cst_67 = arith.constant 1.000000e+00 : f32
    %138 = vector.broadcast %cst_67 : f32 to vector<8x32xf32>
    %139 = arith.addf %138, %137 : vector<8x32xf32>
    %cst_68 = arith.constant 5.000000e-01 : f32
    %140 = vector.broadcast %cst_68 : f32 to vector<8x32xf32>
    %141 = arith.mulf %140, %139 : vector<8x32xf32>
    %142 = arith.mulf %129, %141 : vector<8x32xf32>
    %143 = vector.broadcast %91 : vector<8x1xf32> to vector<8x32xf32>
    %144 = arith.mulf %142, %143 : vector<8x32xf32>
    %c1_i32_69 = arith.constant 1 : i32
    %145 = tpu.dynamic_rotate %144 by %c1_i32_69 dim 0 : vector<8x32xf32>, i32 -> vector<8x32xf32>
    %cst_70 = arith.constant 0.000000e+00 : f32
    %146 = vector.shape_cast %101 : vector<8x1xi1> to vector<8x1xi1>
    %147 = vector.broadcast %146 : vector<8x1xi1> to vector<8x32xi1>
    %148 = vector.broadcast %cst_70 : f32 to vector<8x32xf32>
    %149 = arith.select %147, %145, %148 : vector<8x32xi1>, vector<8x32xf32>
    %c7_i32_71 = arith.constant 7 : i32
    %150 = tpu.dynamic_rotate %144 by %c7_i32_71 dim 0 : vector<8x32xf32>, i32 -> vector<8x32xf32>
    %cst_72 = arith.constant 0.000000e+00 : f32
    %151 = vector.shape_cast %110 : vector<8x1xi1> to vector<8x1xi1>
    %152 = vector.broadcast %151 : vector<8x1xi1> to vector<8x32xi1>
    %153 = vector.broadcast %cst_72 : f32 to vector<8x32xf32>
    %154 = arith.select %152, %150, %153 : vector<8x32xi1>, vector<8x32xf32>
    %155 = tpu.concatenate %149, %144, %154 in 1 : vector<8x32xf32>, vector<8x32xf32>, vector<8x32xf32> -> vector<8x96xf32>
    %c0_73 = arith.constant 0 : index
    %c0_74 = arith.constant 0 : index
    %156 = vector.load %arg10[%c0_73, %c0_74] : memref<96x32xf32, #tpu.memory_space<vmem>>, vector<96x32xf32>
    %cst_75 = arith.constant dense<0.000000e+00> : vector<8x32xf32>
    %157 = tpu.matmul %155, %156, %cst_75 {dimension_numbers = #tpu.dot_dimension_numbers<[1], [0], [0], [1], [0, 0, 1, 1], [], []>} : vector<8x96xf32>, vector<96x32xf32>, vector<8x32xf32> -> vector<8x32xf32>
    %c0_76 = arith.constant 0 : index
    %c0_77 = arith.constant 0 : index
    %158 = vector.load %arg11[%c0_76, %c0_77] : memref<1x32xf32, #tpu.memory_space<vmem>>, vector<1x32xf32>
    %159 = vector.broadcast %158 : vector<1x32xf32> to vector<8x32xf32>
    %160 = arith.addf %157, %159 : vector<8x32xf32>
    %161 = arith.mulf %160, %160 : vector<8x32xf32>
    %162 = arith.mulf %160, %161 : vector<8x32xf32>
    %cst_78 = arith.constant 4.471500e-02 : f32
    %163 = vector.broadcast %cst_78 : f32 to vector<8x32xf32>
    %164 = arith.mulf %163, %162 : vector<8x32xf32>
    %165 = arith.addf %160, %164 : vector<8x32xf32>
    %cst_79 = arith.constant 0.797884583 : f32
    %166 = vector.broadcast %cst_79 : f32 to vector<8x32xf32>
    %167 = arith.mulf %166, %165 : vector<8x32xf32>
    %168 = math.tanh %167 : vector<8x32xf32>
    %cst_80 = arith.constant 1.000000e+00 : f32
    %169 = vector.broadcast %cst_80 : f32 to vector<8x32xf32>
    %170 = arith.addf %169, %168 : vector<8x32xf32>
    %cst_81 = arith.constant 5.000000e-01 : f32
    %171 = vector.broadcast %cst_81 : f32 to vector<8x32xf32>
    %172 = arith.mulf %171, %170 : vector<8x32xf32>
    %173 = arith.mulf %160, %172 : vector<8x32xf32>
    %174 = vector.shape_cast %173 : vector<8x32xf32> to vector<1x8x32xf32>
    %175 = tpu.concatenate %89, %0 in 2 : vector<1x8x32xf32>, vector<1x8x32xf32> -> vector<1x8x64xf32>
    %176 = tpu.concatenate %174, %1 in 2 : vector<1x8x32xf32>, vector<1x8x32xf32> -> vector<1x8x64xf32>
    %cst_82 = arith.constant 1.250000e-01 : f32
    %177 = vector.broadcast %cst_82 : f32 to vector<1x8x64xf32>
    %178 = arith.mulf %175, %177 : vector<1x8x64xf32>
    "tpu.trace_start"() <{level = 10 : i32, message = "bpd,bqd->bpq"}> : () -> ()
    %cst_83 = arith.constant dense<0.000000e+00> : vector<1x8x8xf32>
    %179 = tpu.matmul %178, %176, %cst_83 {dimension_numbers = #tpu.dot_dimension_numbers<[2], [2], [1], [1], [0, 0, 0, 1, 1, 1], [0], [0]>} : vector<1x8x64xf32>, vector<1x8x64xf32>, vector<1x8x8xf32> -> vector<1x8x8xf32>
    %cst_84 = arith.constant 0.000000e+00 : f32
    "tpu.trace_stop"() : () -> ()
    %180 = vector.broadcast %cst_84 : f32 to vector<1x8x1xf32>
    %181 = arith.cmpf ogt, %2, %180 : vector<1x8x1xf32>
    %cst_85 = arith.constant 0.000000e+00 : f32
    %182 = vector.broadcast %cst_85 : f32 to vector<1x1x8xf32>
    %183 = arith.cmpf ogt, %4, %182 : vector<1x1x8xf32>
    %184 = vector.broadcast %181 : vector<1x8x1xi1> to vector<1x8x8xi1>
    %185 = vector.broadcast %183 : vector<1x1x8xi1> to vector<1x8x8xi1>
    %186 = arith.andi %184, %185 : vector<1x8x8xi1>
    %cst_86 = arith.constant -1.000000e+07 : f32
    %187 = vector.broadcast %cst_86 : f32 to vector<1x8x8xf32>
    %188 = arith.select %186, %179, %187 : vector<1x8x8xi1>, vector<1x8x8xf32>
    %cst_87 = arith.constant dense<0xFF800000> : vector<1x8xf32>
    %189 = vector.multi_reduction <maximumf>, %188, %cst_87 [2] : vector<1x8x8xf32> to vector<1x8xf32>
    %190 = vector.shape_cast %189 : vector<1x8xf32> to vector<1x8x1xf32>
    %cst_88 = arith.constant dense<0xFF800000> : vector<1x1xf32>
    %191 = vector.multi_reduction <maximumf>, %190, %cst_88 [1] : vector<1x8x1xf32> to vector<1x1xf32>
    %192 = vector.shape_cast %191 : vector<1x1xf32> to vector<1x1x1xf32>
    %193 = vector.broadcast %192 : vector<1x1x1xf32> to vector<1x8x8xf32>
    %194 = arith.subf %188, %193 : vector<1x8x8xf32>
    %195 = math.exp %194 : vector<1x8x8xf32>
    %cst_89 = arith.constant dense<0.000000e+00> : vector<1x8xf32>
    %196 = vector.multi_reduction <add>, %195, %cst_89 [2] : vector<1x8x8xf32> to vector<1x8xf32>
    %197 = vector.shape_cast %196 : vector<1x8xf32> to vector<1x8x1xf32>
    %cst_90 = arith.constant 9.99999968E-21 : f32
    %198 = vector.broadcast %cst_90 : f32 to vector<1x8x1xf32>
    %199 = arith.addf %197, %198 : vector<1x8x1xf32>
    %200 = tpu.reciprocal %199 {approx = true} : vector<1x8x1xf32> -> vector<1x8x1xf32>
    %cst_91 = arith.constant dense<0.000000e+00> : vector<1x8xf32>
    %201 = vector.multi_reduction <add>, %195, %cst_91 [1] : vector<1x8x8xf32> to vector<1x8xf32>
    %202 = vector.shape_cast %201 : vector<1x8xf32> to vector<1x1x8xf32>
    %cst_92 = arith.constant 9.99999968E-21 : f32
    %203 = vector.broadcast %cst_92 : f32 to vector<1x1x8xf32>
    %204 = arith.addf %202, %203 : vector<1x1x8xf32>
    %205 = tpu.reciprocal %204 {approx = true} : vector<1x1x8xf32> -> vector<1x1x8xf32>
    "tpu.trace_start"() <{level = 10 : i32, message = "bpq,bqd->bpd"}> : () -> ()
    %cst_93 = arith.constant dense<0.000000e+00> : vector<1x8x64xf32>
    %206 = tpu.matmul %195, %176, %cst_93 {dimension_numbers = #tpu.dot_dimension_numbers<[2], [1], [1], [2], [0, 0, 0, 1, 1, 2], [0], [0]>} : vector<1x8x8xf32>, vector<1x8x64xf32>, vector<1x8x64xf32> -> vector<1x8x64xf32>
    "tpu.trace_stop"() : () -> ()
    %207 = vector.broadcast %200 : vector<1x8x1xf32> to vector<1x8x64xf32>
    %208 = arith.mulf %206, %207 : vector<1x8x64xf32>
    %209 = vector.broadcast %205 : vector<1x1x8xf32> to vector<1x8x8xf32>
    %210 = arith.mulf %195, %209 : vector<1x8x8xf32>
    %211 = tpu.transpose %210, [0, 2, 1] : vector<1x8x8xf32> -> vector<1x8x8xf32>
    "tpu.trace_start"() <{level = 10 : i32, message = "bqp,bpd->bqd"}> : () -> ()
    %cst_94 = arith.constant dense<0.000000e+00> : vector<1x8x64xf32>
    %212 = tpu.matmul %211, %175, %cst_94 {dimension_numbers = #tpu.dot_dimension_numbers<[2], [1], [1], [2], [0, 0, 0, 1, 1, 2], [0], [0]>} : vector<1x8x8xf32>, vector<1x8x64xf32>, vector<1x8x64xf32> -> vector<1x8x64xf32>
    "tpu.trace_stop"() : () -> ()
    %213 = vector.shape_cast %175 : vector<1x8x64xf32> to vector<8x64xf32>
    %214 = vector.shape_cast %176 : vector<1x8x64xf32> to vector<8x64xf32>
    %215 = tpu.concatenate %213, %214 in 0 : vector<8x64xf32>, vector<8x64xf32> -> vector<16x64xf32>
    %216 = vector.shape_cast %208 : vector<1x8x64xf32> to vector<8x64xf32>
    %217 = vector.shape_cast %212 : vector<1x8x64xf32> to vector<8x64xf32>
    %218 = tpu.concatenate %216, %217 in 0 : vector<8x64xf32>, vector<8x64xf32> -> vector<16x64xf32>
    %219 = tpu.concatenate %215, %218 in 1 : vector<16x64xf32>, vector<16x64xf32> -> vector<16x128xf32>
    %c0_95 = arith.constant 0 : index
    %c0_96 = arith.constant 0 : index
    %220 = vector.load %arg12[%c0_95, %c0_96] : memref<128x32xf32, #tpu.memory_space<vmem>>, vector<128x32xf32>
    %cst_97 = arith.constant dense<0.000000e+00> : vector<16x32xf32>
    %221 = tpu.matmul %219, %220, %cst_97 {dimension_numbers = #tpu.dot_dimension_numbers<[1], [0], [0], [1], [0, 0, 1, 1], [], []>} : vector<16x128xf32>, vector<128x32xf32>, vector<16x32xf32> -> vector<16x32xf32>
    %c0_98 = arith.constant 0 : index
    %c0_99 = arith.constant 0 : index
    %222 = vector.load %arg13[%c0_98, %c0_99] : memref<1x32xf32, #tpu.memory_space<vmem>>, vector<1x32xf32>
    %223 = vector.broadcast %222 : vector<1x32xf32> to vector<16x32xf32>
    %224 = arith.addf %221, %223 : vector<16x32xf32>
    %225 = arith.mulf %224, %224 : vector<16x32xf32>
    %226 = arith.mulf %224, %225 : vector<16x32xf32>
    %cst_100 = arith.constant 4.471500e-02 : f32
    %227 = vector.broadcast %cst_100 : f32 to vector<16x32xf32>
    %228 = arith.mulf %227, %226 : vector<16x32xf32>
    %229 = arith.addf %224, %228 : vector<16x32xf32>
    %cst_101 = arith.constant 0.797884583 : f32
    %230 = vector.broadcast %cst_101 : f32 to vector<16x32xf32>
    %231 = arith.mulf %230, %229 : vector<16x32xf32>
    %232 = math.tanh %231 : vector<16x32xf32>
    %cst_102 = arith.constant 1.000000e+00 : f32
    %233 = vector.broadcast %cst_102 : f32 to vector<16x32xf32>
    %234 = arith.addf %233, %232 : vector<16x32xf32>
    %cst_103 = arith.constant 5.000000e-01 : f32
    %235 = vector.broadcast %cst_103 : f32 to vector<16x32xf32>
    %236 = arith.mulf %235, %234 : vector<16x32xf32>
    %237 = arith.mulf %224, %236 : vector<16x32xf32>
    %238 = arith.subf %215, %218 : vector<16x64xf32>
    %239 = tpu.concatenate %215, %238 in 1 : vector<16x64xf32>, vector<16x64xf32> -> vector<16x128xf32>
    %c0_104 = arith.constant 0 : index
    %c0_105 = arith.constant 0 : index
    %240 = vector.load %arg14[%c0_104, %c0_105] : memref<128x32xf32, #tpu.memory_space<vmem>>, vector<128x32xf32>
    %cst_106 = arith.constant dense<0.000000e+00> : vector<16x32xf32>
    %241 = tpu.matmul %239, %240, %cst_106 {dimension_numbers = #tpu.dot_dimension_numbers<[1], [0], [0], [1], [0, 0, 1, 1], [], []>} : vector<16x128xf32>, vector<128x32xf32>, vector<16x32xf32> -> vector<16x32xf32>
    %c0_107 = arith.constant 0 : index
    %c0_108 = arith.constant 0 : index
    %242 = vector.load %arg15[%c0_107, %c0_108] : memref<1x32xf32, #tpu.memory_space<vmem>>, vector<1x32xf32>
    %243 = vector.broadcast %242 : vector<1x32xf32> to vector<16x32xf32>
    %244 = arith.addf %241, %243 : vector<16x32xf32>
    %245 = arith.mulf %244, %244 : vector<16x32xf32>
    %246 = arith.mulf %244, %245 : vector<16x32xf32>
    %cst_109 = arith.constant 4.471500e-02 : f32
    %247 = vector.broadcast %cst_109 : f32 to vector<16x32xf32>
    %248 = arith.mulf %247, %246 : vector<16x32xf32>
    %249 = arith.addf %244, %248 : vector<16x32xf32>
    %cst_110 = arith.constant 0.797884583 : f32
    %250 = vector.broadcast %cst_110 : f32 to vector<16x32xf32>
    %251 = arith.mulf %250, %249 : vector<16x32xf32>
    %252 = math.tanh %251 : vector<16x32xf32>
    %cst_111 = arith.constant 1.000000e+00 : f32
    %253 = vector.broadcast %cst_111 : f32 to vector<16x32xf32>
    %254 = arith.addf %253, %252 : vector<16x32xf32>
    %cst_112 = arith.constant 5.000000e-01 : f32
    %255 = vector.broadcast %cst_112 : f32 to vector<16x32xf32>
    %256 = arith.mulf %255, %254 : vector<16x32xf32>
    %257 = arith.mulf %244, %256 : vector<16x32xf32>
    %258 = arith.mulf %215, %218 : vector<16x64xf32>
    %259 = tpu.concatenate %215, %258 in 1 : vector<16x64xf32>, vector<16x64xf32> -> vector<16x128xf32>
    %c0_113 = arith.constant 0 : index
    %c0_114 = arith.constant 0 : index
    %260 = vector.load %arg16[%c0_113, %c0_114] : memref<128x32xf32, #tpu.memory_space<vmem>>, vector<128x32xf32>
    %cst_115 = arith.constant dense<0.000000e+00> : vector<16x32xf32>
    %261 = tpu.matmul %259, %260, %cst_115 {dimension_numbers = #tpu.dot_dimension_numbers<[1], [0], [0], [1], [0, 0, 1, 1], [], []>} : vector<16x128xf32>, vector<128x32xf32>, vector<16x32xf32> -> vector<16x32xf32>
    %c0_116 = arith.constant 0 : index
    %c0_117 = arith.constant 0 : index
    %262 = vector.load %arg17[%c0_116, %c0_117] : memref<1x32xf32, #tpu.memory_space<vmem>>, vector<1x32xf32>
    %263 = vector.broadcast %262 : vector<1x32xf32> to vector<16x32xf32>
    %264 = arith.addf %261, %263 : vector<16x32xf32>
    %265 = arith.mulf %264, %264 : vector<16x32xf32>
    %266 = arith.mulf %264, %265 : vector<16x32xf32>
    %cst_118 = arith.constant 4.471500e-02 : f32
    %267 = vector.broadcast %cst_118 : f32 to vector<16x32xf32>
    %268 = arith.mulf %267, %266 : vector<16x32xf32>
    %269 = arith.addf %264, %268 : vector<16x32xf32>
    %cst_119 = arith.constant 0.797884583 : f32
    %270 = vector.broadcast %cst_119 : f32 to vector<16x32xf32>
    %271 = arith.mulf %270, %269 : vector<16x32xf32>
    %272 = math.tanh %271 : vector<16x32xf32>
    %cst_120 = arith.constant 1.000000e+00 : f32
    %273 = vector.broadcast %cst_120 : f32 to vector<16x32xf32>
    %274 = arith.addf %273, %272 : vector<16x32xf32>
    %cst_121 = arith.constant 5.000000e-01 : f32
    %275 = vector.broadcast %cst_121 : f32 to vector<16x32xf32>
    %276 = arith.mulf %275, %274 : vector<16x32xf32>
    %277 = arith.mulf %264, %276 : vector<16x32xf32>
    %278 = tpu.concatenate %237, %257, %277 in 1 : vector<16x32xf32>, vector<16x32xf32>, vector<16x32xf32> -> vector<16x96xf32>
    %c0_122 = arith.constant 0 : index
    %c0_123 = arith.constant 0 : index
    %279 = vector.load %arg18[%c0_122, %c0_123] : memref<96x32xf32, #tpu.memory_space<vmem>>, vector<96x32xf32>
    %cst_124 = arith.constant dense<0.000000e+00> : vector<16x32xf32>
    %280 = tpu.matmul %278, %279, %cst_124 {dimension_numbers = #tpu.dot_dimension_numbers<[1], [0], [0], [1], [0, 0, 1, 1], [], []>} : vector<16x96xf32>, vector<96x32xf32>, vector<16x32xf32> -> vector<16x32xf32>
    %c0_125 = arith.constant 0 : index
    %c0_126 = arith.constant 0 : index
    %281 = vector.load %arg19[%c0_125, %c0_126] : memref<1x32xf32, #tpu.memory_space<vmem>>, vector<1x32xf32>
    %282 = vector.broadcast %281 : vector<1x32xf32> to vector<16x32xf32>
    %283 = arith.addf %280, %282 : vector<16x32xf32>
    %284 = arith.mulf %283, %283 : vector<16x32xf32>
    %285 = arith.mulf %283, %284 : vector<16x32xf32>
    %cst_127 = arith.constant 4.471500e-02 : f32
    %286 = vector.broadcast %cst_127 : f32 to vector<16x32xf32>
    %287 = arith.mulf %286, %285 : vector<16x32xf32>
    %288 = arith.addf %283, %287 : vector<16x32xf32>
    %cst_128 = arith.constant 0.797884583 : f32
    %289 = vector.broadcast %cst_128 : f32 to vector<16x32xf32>
    %290 = arith.mulf %289, %288 : vector<16x32xf32>
    %291 = math.tanh %290 : vector<16x32xf32>
    %cst_129 = arith.constant 1.000000e+00 : f32
    %292 = vector.broadcast %cst_129 : f32 to vector<16x32xf32>
    %293 = arith.addf %292, %291 : vector<16x32xf32>
    %cst_130 = arith.constant 5.000000e-01 : f32
    %294 = vector.broadcast %cst_130 : f32 to vector<16x32xf32>
    %295 = arith.mulf %294, %293 : vector<16x32xf32>
    %296 = arith.mulf %283, %295 : vector<16x32xf32>
    %297 = vector.extract_strided_slice %296 {offsets = [0, 0], sizes = [8, 32], strides = [1, 1]} : vector<16x32xf32> to vector<8x32xf32>
    %298 = vector.shape_cast %297 : vector<8x32xf32> to vector<1x8x32xf32>
    %299 = vector.extract_strided_slice %296 {offsets = [8, 0], sizes = [8, 32], strides = [1, 1]} : vector<16x32xf32> to vector<8x32xf32>
    %300 = vector.shape_cast %299 : vector<8x32xf32> to vector<1x8x32xf32>
    %c0_131 = arith.constant 0 : index
    %c0_132 = arith.constant 0 : index
    %c0_133 = arith.constant 0 : index
    %301 = vector.load %arg20[%c0_131, %c0_132, %c0_133] : memref<1x8x32xf32, #tpu.memory_space<vmem>>, vector<1x8x32xf32>
    tpu.vector_store %arg20[%c0_131, %c0_132, %c0_133], %298 {strides = array<i32>} : memref<1x8x32xf32, #tpu.memory_space<vmem>>, vector<1x8x32xf32>,
    %c0_134 = arith.constant 0 : index
    %c0_135 = arith.constant 0 : index
    %c0_136 = arith.constant 0 : index
    %302 = vector.load %arg21[%c0_134, %c0_135, %c0_136] : memref<1x8x32xf32, #tpu.memory_space<vmem>>, vector<1x8x32xf32>
    tpu.vector_store %arg21[%c0_134, %c0_135, %c0_136], %300 {strides = array<i32>} : memref<1x8x32xf32, #tpu.memory_space<vmem>>, vector<1x8x32xf32>,
    return
  }
  func.func @transform_0(%arg0: i32) -> (i32, i32, i32) {
    %c0_i32 = arith.constant 0 : i32
    %c0_i32_0 = arith.constant 0 : i32
    %c0_i32_1 = arith.constant 0 : i32
    return %arg0, %c0_i32, %c0_i32_0 : i32, i32, i32
  }
  func.func @transform_1(%arg0: i32) -> (i32, i32, i32) {
    %c0_i32 = arith.constant 0 : i32
    %c0_i32_0 = arith.constant 0 : i32
    %c0_i32_1 = arith.constant 0 : i32
    return %arg0, %c0_i32, %c0_i32_0 : i32, i32, i32
  }
  func.func @transform_2(%arg0: i32) -> (i32, i32, i32) {
    %c0_i32 = arith.constant 0 : i32
    %c0_i32_0 = arith.constant 0 : i32
    %c0_i32_1 = arith.constant 0 : i32
    return %arg0, %c0_i32, %c0_i32_0 : i32, i32, i32
  }
  func.func @transform_3(%arg0: i32) -> (i32, i32, i32) {
    %c0_i32 = arith.constant 0 : i32
    %c0_i32_0 = arith.constant 0 : i32
    %c0_i32_1 = arith.constant 0 : i32
    return %arg0, %c0_i32, %c0_i32_0 : i32, i32, i32
  }
  func.func @transform_4(%arg0: i32) -> (i32, i32, i32) {
    %c0_i32 = arith.constant 0 : i32
    %c0_i32_0 = arith.constant 0 : i32
    %c0_i32_1 = arith.constant 0 : i32
    return %arg0, %c0_i32, %c0_i32_0 : i32, i32, i32
  }
  func.func @transform_5(%arg0: i32) -> (i32, i32, i32) {
    %c0_i32 = arith.constant 0 : i32
    %c0_i32_0 = arith.constant 0 : i32
    %c0_i32_1 = arith.constant 0 : i32
    return %arg0, %c0_i32, %c0_i32_0 : i32, i32, i32
  }
  func.func @transform_6(%arg0: i32) -> (i32, i32, i32) {
    %c0_i32 = arith.constant 0 : i32
    %c0_i32_0 = arith.constant 0 : i32
    %c0_i32_1 = arith.constant 0 : i32
    return %arg0, %c0_i32, %c0_i32_0 : i32, i32, i32
  }
  func.func @transform_7(%arg0: i32) -> (i32, i32) {
    %c0_i32 = arith.constant 0 : i32
    %c0_i32_0 = arith.constant 0 : i32
    %c0_i32_1 = arith.constant 0 : i32
    return %c0_i32, %c0_i32_0 : i32, i32
  }
  func.func @transform_8(%arg0: i32) -> (i32, i32) {
    %c0_i32 = arith.constant 0 : i32
    %c0_i32_0 = arith.constant 0 : i32
    %c0_i32_1 = arith.constant 0 : i32
    return %c0_i32, %c0_i32_0 : i32, i32
  }
  func.func @transform_9(%arg0: i32) -> (i32, i32) {
    %c0_i32 = arith.constant 0 : i32
    %c0_i32_0 = arith.constant 0 : i32
    %c0_i32_1 = arith.constant 0 : i32
    return %c0_i32, %c0_i32_0 : i32, i32
  }
  func.func @transform_10(%arg0: i32) -> (i32, i32) {
    %c0_i32 = arith.constant 0 : i32
    %c0_i32_0 = arith.constant 0 : i32
    %c0_i32_1 = arith.constant 0 : i32
    return %c0_i32, %c0_i32_0 : i32, i32
  }
  func.func @transform_11(%arg0: i32) -> (i32, i32) {
    %c0_i32 = arith.constant 0 : i32
    %c0_i32_0 = arith.constant 0 : i32
    %c0_i32_1 = arith.constant 0 : i32
    return %c0_i32, %c0_i32_0 : i32, i32
  }
  func.func @transform_12(%arg0: i32) -> (i32, i32) {
    %c0_i32 = arith.constant 0 : i32
    %c0_i32_0 = arith.constant 0 : i32
    %c0_i32_1 = arith.constant 0 : i32
    return %c0_i32, %c0_i32_0 : i32, i32
  }
  func.func @transform_13(%arg0: i32) -> (i32, i32) {
    %c0_i32 = arith.constant 0 : i32
    %c0_i32_0 = arith.constant 0 : i32
    %c0_i32_1 = arith.constant 0 : i32
    return %c0_i32, %c0_i32_0 : i32, i32
  }
  func.func @transform_14(%arg0: i32) -> (i32, i32) {
    %c0_i32 = arith.constant 0 : i32
    %c0_i32_0 = arith.constant 0 : i32
    %c0_i32_1 = arith.constant 0 : i32
    return %c0_i32, %c0_i32_0 : i32, i32
  }
  func.func @transform_15(%arg0: i32) -> (i32, i32) {
    %c0_i32 = arith.constant 0 : i32
    %c0_i32_0 = arith.constant 0 : i32
    %c0_i32_1 = arith.constant 0 : i32
    return %c0_i32, %c0_i32_0 : i32, i32
  }
  func.func @transform_16(%arg0: i32) -> (i32, i32) {
    %c0_i32 = arith.constant 0 : i32
    %c0_i32_0 = arith.constant 0 : i32
    %c0_i32_1 = arith.constant 0 : i32
    return %c0_i32, %c0_i32_0 : i32, i32
  }
  func.func @transform_17(%arg0: i32) -> (i32, i32) {
    %c0_i32 = arith.constant 0 : i32
    %c0_i32_0 = arith.constant 0 : i32
    %c0_i32_1 = arith.constant 0 : i32
    return %c0_i32, %c0_i32_0 : i32, i32
  }
  func.func @transform_18(%arg0: i32) -> (i32, i32) {
    %c0_i32 = arith.constant 0 : i32
    %c0_i32_0 = arith.constant 0 : i32
    %c0_i32_1 = arith.constant 0 : i32
    return %c0_i32, %c0_i32_0 : i32, i32
  }
  func.func @transform_19(%arg0: i32) -> (i32, i32, i32) {
    %c0_i32 = arith.constant 0 : i32
    %c0_i32_0 = arith.constant 0 : i32
    %c0_i32_1 = arith.constant 0 : i32
    return %arg0, %c0_i32, %c0_i32_0 : i32, i32, i32
  }
  func.func @transform_20(%arg0: i32) -> (i32, i32, i32) {
    %c0_i32 = arith.constant 0 : i32
    %c0_i32_0 = arith.constant 0 : i32
    %c0_i32_1 = arith.constant 0 : i32
    return %arg0, %c0_i32, %c0_i32_0 : i32, i32, i32
  }
}

</mosaic_0001>

<bundles_post_ra>
// kernel: tpu_custom_call.1
= control target key start
LH: loop header
LB: loop body
LE: loop exit
PB: predicated region body
PF: predicated region fallthrough
CT: control target
= control target key end

     0   :  { %s2544_s0 = inlined_call_operand.vmem [shape: f32[2,8,32], index: 0, kind: input, shape index: {}]   ;;  %s2545_s1 = inlined_call_operand.vmem [shape: f32[2,8,32], index: 1, kind: input, shape index: {}]   ;;  %s2546_s2 = inlined_call_operand.vmem [shape: f32[2,8,1], index: 2, kind: input, shape index: {}]   ;;  %s2547_s3 = inlined_call_operand.vmem [shape: f32[2,8,1], index: 3, kind: input, shape index: {}]   ;;  %s2548_s4 = inlined_call_operand.vmem [shape: f32[2,1,8], index: 4, kind: input, shape index: {}]   ;;  %s2549_s5 = inlined_call_operand.vmem [shape: s32[2,8,1], index: 5, kind: input, shape index: {}]   ;;  %s2550_s6 = inlined_call_operand.vmem [shape: s32[2,8,1], index: 6, kind: input, shape index: {}]   ;;  %s2551_s7 = inlined_call_operand.vmem [shape: f32[96,32], index: 7, kind: input, shape index: {}]   ;;  %s2552_s8 = inlined_call_operand.vmem [shape: f32[1,32], index: 8, kind: input, shape index: {}]   ;;  %s2553_s9 = inlined_call_operand.vmem [shape: f32[96,32], index: 9, kind: input, shape index: {}]   ;;  %s2554_s10 = inlined_call_operand.vmem [shape: f32[1,32], index: 10, kind: input, shape index: {}]   ;;  %s2555_s11 = inlined_call_operand.vmem [shape: f32[128,32], index: 11, kind: input, shape index: {}]   ;;  %s2556_s12 = inlined_call_operand.vmem [shape: f32[1,32], index: 12, kind: input, shape index: {}]   ;;  %s2557_s13 = inlined_call_operand.vmem [shape: f32[128,32], index: 13, kind: input, shape index: {}]   ;;  %s2558_s14 = inlined_call_operand.vmem [shape: f32[1,32], index: 14, kind: input, shape index: {}]   ;;  %s2559_s15 = inlined_call_operand.vmem [shape: f32[128,32], index: 15, kind: input, shape index: {}]   ;;  %s2560_s16 = inlined_call_operand.vmem [shape: f32[1,32], index: 16, kind: input, shape index: {}]   ;;  %s2561_s17 = inlined_call_operand.vmem [shape: f32[96,32], index: 17, kind: input, shape index: {}]   ;;  %s2562_s18 = inlined_call_operand.vmem [shape: f32[1,32], index: 18, kind: input, shape index: {}]   ;;  %s2563_s19 = inlined_call_operand.hbm [shape: f32[2,8,32], index: 19, kind: output, shape index: {0}]   ;;  %s2564_s20 = inlined_call_operand.hbm [shape: f32[2,8,32], index: 20, kind: output, shape index: {1}]  }
   0x1   :  { %2577 = sst [smem:[#allocation16_spill]] %s2544_s0 }
   0x2   :  { %2578 = sst [smem:[#allocation17_spill]] %s2545_s1 }
   0x3   :  { %2579 = sst [smem:[#allocation18_spill]] %s2546_s2 }
   0x4   :  { %2580 = sst [smem:[#allocation19_spill]] %s2547_s3 }
   0x5   :  { %2581 = sst [smem:[#allocation20_spill]] %s2548_s4 }
   0x6   :  { %2582 = sst [smem:[#allocation21_spill]] %s2549_s5 }
   0x7   :  { %2583 = sst [smem:[#allocation22_spill]] %s2550_s6 }
   0x8   :  { %2584 = sst [smem:[#allocation23_spill]] %s2563_s19 }
   0x9   :  { %2585 = sst [smem:[#allocation24_spill]] %s2564_s20 }
   0xa   :  { %26 = vsyncpa [#allocation3], 0 }
   0xb   :  { %28 = vsyncpa [#allocation3 + $0x1], 0 }
   0xc   :  { %29 = vsyncpa [#allocation5], 0 }
   0xd   :  { %31 = vsyncpa [#allocation5 + $0x1], 0  ;;  %s1993_s1 = smov 0   ;;  %s1995_s22 = smov 0  }
   0xe   :  { %s1997_s23 = smov 0   ;;  %s1999_s24 = smov 0  }
   0xf LB: > { %2586 = sst [smem:[#allocation8_spill]] %s1871_s1  ;;  %s2014_s2 = sadd.s32 4294967295, %s1883_s24   ;;  %s1883_s24 = sphi %s1999_s24, %s2611_s24   ;;  %s1879_s23 = sphi %s1997_s23, %s2613_s23   ;;  %s1875_s22 = sphi %s1995_s22, %s2615_s22   ;;  %s1871_s1 = sphi %s1993_s1, %s2614_s1  }
  0x10   : > { %2587 = sst [smem:[#allocation9_spill]] %s1879_s23  ;;  %s1664_s25 = sadd.s32 4294967294, %s1883_s24  }
  0x11   : > { %2588 = sst [smem:[#allocation10_spill]] %s1883_s24  ;;  %s2018_s3 = sadd.s32 1, %s1883_s24  }
  0x12   : > { %2589 = sst [smem:[#allocation11_spill]] %s2014_s2  ;;  %s478_s26 = sadd.s32 1, %s1879_s23 }
  0x13   : > { %2590 = sst [smem:[#allocation12_spill]] %s2018_s3  ;;  %s475_s27 = ssub.s32 %s1883_s24, %s2018_s3 }
  0x14   : > { %p488_p0 = scmp.ne.s32.totalorder %s1879_s23, %s1875_s22  ;;  %p476_p1 = scmp.eq.s32.totalorder %s475_s27, 0 }
  0x15   : > { %p489_p2 = scmp.eq.s32.totalorder %s2014_s2, 1  ;;  %p494_p3 = scmp.ne.s32.totalorder %s1875_s22, %s1871_s1 }
  0x16   : > { %p495_p4 = scmp.eq.s32.totalorder %s1664_s25, 1  ;;  %p1667_p7 = scmp.ge.s32.totalorder %s1883_s24, 1 }
  0x17   : > { %s2029_s28 = scalar_select %p476_p1, %s1879_s23, %s478_s26  }
  0x18   : > { %p2031_p5 = por %p489_p2, %p488_p0  ;;  %p2035_p6 = por %p495_p4, %p494_p3 }
  0x19   : > { %2591 = sst [smem:[#allocation13_spill]] %s2029_s28  ;;  %p623_p8 = scmp.lt.s32.totalorder %s1883_s24, 3 }
  0x1a   : > { %s2592_s4 = scalar_select %p2031_p5, 1, 0 }
  0x1b   : > { %s2594_s29 = scalar_select %p2035_p6, 1, 0 }
  0x1c   : > { %2593 = sst [smem:[#allocation14_spill]] %s2592_s4  ;;  %p624_p9 = pnand %p1667_p7, %p623_p8 }
  0x1d   : > { %2595 = sst [smem:[#allocation15_spill]] %s2594_s29  ;;  %p708_p10 = scmp.lt.s32.totalorder (!%p624_p9), %s2014_s2, 1 }
  0x1e   : > { %627 = sbr.rel (%p624_p9) target bundleno = 1855 (0x73f), region = 96  ;;  %s2596_s26 = sld [smem:[#allocation19_spill]] (!%p624_p9) }
  0x1f   : > { %s2597_s3 = sld [smem:[#allocation18_spill]] (!%p624_p9)  ;;  %s1886_s4 = smov (!%p624_p9), 32  }
  0x20   : > { %s2598_s6 = sld [smem:[#allocation22_spill]] (!%p624_p9)  ;;  %s2485_s19 = sand.u32 (!%p624_p9), 1, %s1875_s22  }
  0x21   : > { %s2599_s5 = sld [smem:[#allocation21_spill]] (!%p624_p9) }
  0x22   : > { %s2600_s1 = sld [smem:[#allocation17_spill]] (!%p624_p9) }
  0x23   : > { %v1885_v0 = vmov 0   ;;  %s2045_s30 = scalar_select %p708_p10, %s2014_s2, 1  ;;  %v792_v25 = vld [vmem:[%s2551_s7 + $0x58] sm:$0xff]  ;;  %v791_v26 = vld [vmem:[%s2551_s7 + $0x50] sm:$0xff]  ;;  %v790_v27 = vld [vmem:[%s2551_s7 + $0x48] sm:$0xff]  ;;  %vm777_vm15 = vcmask 261120  }
  0x24   : > { %1741 = vset.pattern.permute.xlu1 %v1885_v0  ;;  %1740 = vset.pattern.permute.xlu0 %v1885_v0  ;;  %v789_v28 = vld [vmem:[%s2551_s7 + $0x40] sm:$0xff]  ;;  %v788_v29 = vld [vmem:[%s2551_s7 + $0x38] sm:$0xff]  ;;  %v787_v30 = vld [vmem:[%s2551_s7 + $0x30] sm:$0xff]  ;;  %s2602_s25 = sld [smem:[#allocation20_spill]] }
  0x25   : > { %1742 = vset.pattern.permute.xlu2 %v1885_v0  ;;  %s2049_s0 = sshll.u32 %s2045_s30, 3  ;;  %939 = vmatpush.msra.mxu2 %v792_v25  ;;  %v786_v31 = vld [vmem:[%s2551_s7 + $0x28] sm:$0xff]  ;;  %v785_v32 = vld [vmem:[%s2551_s7 + $0x20] sm:$0xff]  ;;  %v784_v33 = vld [vmem:[%s2551_s7 + $0x18] sm:$0xff] }
  0x26   : > { %s723_s27 = scalar_lea.vmem %s2596_s26, %s2049_s0  ;;  %s719_s29 = scalar_lea.vmem %s2597_s3, %s2049_s0  ;;  %805 = vmatpush.msra.mxu0 %v792_v25  ;;  %v783_v34 = vld [vmem:[%s2551_s7 + $0x10] sm:$0xff]  ;;  %v782_v35 = vld [vmem:[%s2551_s7 + $0x8] sm:$0xff]  ;;  %v781_v36 = vld [vmem:[%s2551_s7] sm:$0xff] }
  0x27   : > { %v738_v1 = vld [vmem:[%s723_s27] sm:$0xff]  ;;  %s734_s20 = scalar_lea.vmem %s2598_s6, %s2049_s0  ;;  %s730_s2 = scalar_lea.vmem %s2599_s5, %s2049_s0  ;;  %940 = vmatpush.msra.mxu2 %v791_v26 }
  0x28   : > { %v2059_v2 = vld [vmem:[%s719_s29] sm:$0xff]  ;;  %904 = vperm.xlu0 %1740, %v738_v1   ;;  %s715_s23 = scalar_lea.vmem %s2600_s1, %s2049_s0  ;;  %s2601_s3 = sld [smem:[#allocation16_spill]]  ;;  %806 = vmatpush.msra.mxu0 %v791_v26  ;;  %v848_v26 = vld [vmem:[%s2553_s9 + $0x18] sm:$0xff] }
  0x29   : > { %751 = vperm.xlu1 %1741, %v2059_v2   ;;  %v893_v3 = vld [vmem:[%s734_s20] sm:$0xff]  ;;  %s1887_s29 = smov 64   ;;  %941 = vmatpush.msra.mxu2 %v790_v27  ;;  %s2603_s20 = sld [smem:[#allocation11_spill]] }
  0x2a   : > { %v740_v4 = vld [vmem:[%s730_s2] sm:$0xff]  ;;  %v898_v5 = vadd.s32 1, %v893_v3  ;;  %v894_v7 = vadd.s32 4294967295, %v893_v3  ;;  %807 = vmatpush.msra.mxu0 %v790_v27  ;;  %v847_v27 = vld [vmem:[%s2553_s9 + $0x10] sm:$0xff]  ;;  %s726_s26 = scalar_lea.vmem %s2602_s25, %s2045_s30  ;;  %s1469_s25 = scalar_lea.sflag [#allocation3], %s2485_s19 }
  0x2b   : > { %v745_v6 = vadd.s32 1, %v740_v4  ;;  %v741_v8 = vadd.s32 4294967295, %v740_v4  ;;  %v2078_v13 = vld [vmem:[%s715_s23] sm:$0xff]  ;;  %942 = vmatpush.msra.mxu2 %v789_v28 }
  0x2c   : > { %vm899_vm0 = vcmp.ge.s32.totalorder %v898_v5, 0  ;;  %vm900_vm1 = vcmp.lt.s32.totalorder %v898_v5, 8  ;;  %vm895_vm5 = vcmp.ge.s32.totalorder %v894_v7, 0  ;;  %vm896_vm6 = vcmp.lt.s32.totalorder %v894_v7, 8  ;;  %808 = vmatpush.msra.mxu0 %v789_v28  ;;  %v1753_v51 = vld [vmem:[%s2552_s8] ss:$0 sm:$0xff] }
  0x2d   : > { %vm746_vm2 = vcmp.ge.s32.totalorder %v745_v6, 0  ;;  %vm747_vm3 = vcmp.lt.s32.totalorder %v745_v6, 8  ;;  %vm901_vm4 = vmand %vm899_vm0, %vm900_vm1  ;;  %vm742_vm8 = vcmp.ge.s32.totalorder %v741_v8, 0  ;;  %vm743_vm9 = vcmp.lt.s32.totalorder %v741_v8, 8  ;;  %943 = vmatpush.msra.mxu2 %v788_v29  ;;  %v849_v25 = vld [vmem:[%s2553_s9 + $0x20] sm:$0xff]  ;;  %v846_v28 = vld [vmem:[%s2553_s9 + $0x8] sm:$0xff] }
  0x2e   : > { %v916_v9 = vsel %vm901_vm4, 1, %v1885_v0  ;;  %vm748_vm7 = vmand %vm746_vm2, %vm747_vm3  ;;  %s711_s28 = scalar_lea.vmem %s2601_s3, %s2049_s0  ;;  %809 = vmatpush.msra.mxu0 %v788_v29  ;;  %vm779_vm0 = vcmask 523264   ;;  %vm797_vm1 = vcmask 785408   ;;  %vm1048_vm3 = vcmp.gt.f32.partialorder %v2059_v2, 0.0  ;;  %v854_v2 = vld [vmem:[%s2553_s9 + $0x48] sm:$0xff]  ;;  %v845_v29 = vld [vmem:[%s2553_s9] sm:$0xff] }
  0x2f   : > { %v763_v10 = vsel %vm748_vm7, 1, %v1885_v0  ;;  %vm897_vm10 = vmand %vm895_vm5, %vm896_vm6  ;;  %v2091_v17 = vld [vmem:[%s711_s28] sm:$0xff]  ;;  %944 = vmatpush.msra.mxu2 %v787_v30  ;;  %vm1060_vm7 = vcmask 64512   ;;  %s1688_s23 = sshll.u32 %s2603_s20, 3  ;;  %s2605_s3 = sld [smem:[#allocation23_spill]] }
  0x30   : > { %918 = vperm.xlu0 %1740, %v916_v9   ;;  %v909_v11 = vsel %vm897_vm10, 1, %v1885_v0  ;;  %vm744_vm11 = vmand %vm742_vm8, %vm743_vm9  ;;  %810 = vmatpush.msra.mxu0 %v787_v30 }
  0x31   : > { %765 = vperm.xlu1 %1741, %v763_v10   ;;  %911 = vperm.xlu2 %1742, %v909_v11   ;;  %v756_v12 = vsel %vm744_vm11, 1, %v1885_v0 }
  0x32   : > { %945 = vmatpush.msra.mxu2 %v786_v31  ;;  %811 = vmatpush.msra.mxu0 %v786_v31 }
  0x34   : > { %946 = vmatpush.msra.mxu2 %v785_v32  ;;  %812 = vmatpush.msra.mxu0 %v785_v32 }
  0x35   : > { %s1484_s28 = scalar_lea.hbm %s2605_s3, %s1688_s23  ;;  %s1809_s20 = scalar_lea.hbm %s2605_s3, 16 }
  0x36   : > { %947 = vmatpush.msra.mxu2 %v784_v33  ;;  %813 = vmatpush.msra.mxu0 %v784_v33  ;;  %s1488_s21 = sshll.u32 %s1484_s28, 4  ;;  %s1489_s21 = int_to_ptr.hbm [resolvable:$true] %s1488_s21 }
  0x38   : > { %948 = vmatpush.msra.mxu2 %v783_v34  ;;  %814 = vmatpush.msra.mxu0 %v783_v34 }
  0x39   : > { %758 = vperm.xlu1 %1741, %v756_v12  }
  0x3a   : > { %949 = vmatpush.msra.mxu2 %v782_v35  ;;  %815 = vmatpush.msra.mxu0 %v782_v35 }
  0x3c   : > { %950 = vmatpush.msra.mxu2 %v781_v36  ;;  %816 = vmatpush.msra.mxu0 %v781_v36 }
  0x8b   : > { %v2148_v37 = vpop.permute.xlu2 %911 }
  0x8c   : > { %vm913_vm14 = vcmp.eq.s32.totalorder %v2148_v37, 1  ;;  %v1754_v37 = vld [vmem:[%s2554_s10] ss:$0 sm:$0xff] }
  0x9a   : > { %v2080_v14 = vpop.permute.xlu0 %904 }
  0x9b   : > { %v907_v15 = vmul.f32 %v2080_v14, %v2078_v13  ;;  %v2089_v16 = vpop.permute.xlu1 %751 }
  0x9c   : > { %v2095_v18 = vmul.f32 %v2089_v16, %v2091_v17 }
  0x9d   : > { %923 = vrot.lane.b32.xlu2 %v907_v15, %s1886_s4  ;;  %v915_v20 = vrot.slane %v907_v15, 1  ;;  %v908_v38 = vrot.slane %v907_v15, 7 }
  0x9e   : > { %v762_v23 = vrot.slane %v2095_v18, 1  ;;  %v755_v45 = vrot.slane %v2095_v18, 7 }
  0x9f   : > { %v914_v40 = vsel %vm913_vm14, %v908_v38, 0.0 }
  0xa2   : > { %v2097_v19 = vpop.permute.xlu0 %918 }
  0xa3   : > { %vm920_vm12 = vcmp.eq.s32.totalorder %v2097_v19, 1  ;;  %v2105_v22 = vpop.permute.xlu1 %765  ;;  %v855_v19 = vld [vmem:[%s2553_s9 + $0x50] sm:$0xff] }
  0xa4   : > { %v921_v21 = vsel %vm920_vm12, %v915_v20, 0.0  ;;  %vm767_vm13 = vcmp.eq.s32.totalorder %v2105_v22, 1  ;;  %v851_v22 = vld [vmem:[%s2553_s9 + $0x30] sm:$0xff] }
  0xa5   : > { %927 = vrot.lane.b32.xlu0 %v921_v21, %s1887_s29  ;;  %770 = vrot.lane.b32.xlu2 %v2095_v18, %s1886_s4  ;;  %v768_v24 = vsel %vm767_vm13, %v762_v23, 0.0 }
  0xab   : > { %v2154_v43 = vpop.permute.xlu1 %758 }
  0xac   : > { %vm760_vm2 = vcmp.eq.s32.totalorder %v2154_v43, 1 }
  0xad   : > { %774 = vrot.lane.b32.xlu0 %v768_v24, %s1887_s29  ;;  %v761_v47 = vsel %vm760_vm2, %v755_v45, 0.0  ;;  %v850_v24 = vld [vmem:[%s2553_s9 + $0x28] sm:$0xff] }
  0xf7   : > { %v924_v39 = vpop.permute.xlu2 %923 }
  0xf8   : > { %v930_v41 = vsel %vm777_vm15, %v914_v40, %v924_v39 }
  0xff   : > { %v771_v46 = vpop.permute.xlu2 %770 }
 0x100   : > { %v778_v48 = vsel %vm777_vm15, %v761_v47, %v771_v46 }
 0x117   : > { %v928_v42 = vpop.permute.xlu0 %927 }
 0x118   : > { %v931_v44 = vsel %vm779_vm0, %v930_v41, %v928_v42 }
 0x119   : > { %1678 = vmatmul.msk.f32.vlgmr.msra.gmra.mxu2 %vm797_vm1, %v931_v44 }
 0x11f   : > { %v775_v49 = vpop.permute.xlu0 %774 }
 0x120   : > { %v780_v50 = vsel %vm779_vm0, %v778_v48, %v775_v49 }
 0x121   : > { %1676 = vmatmul.msk.f32.vlgmr.msra.gmra.mxu0 %vm797_vm1, %v780_v50 }
 0x19c   : > { %v952_v52 = vpop.f32.mrf.mxu2 }
 0x19d   : > { %v953_v53 = vadd.f32 %v1753_v51, %v952_v52 }
 0x19e   : > { %v818_v54 = vpop.f32.mrf.mxu0 }
 0x19f   : > { %v955_v55 = vmul.f32 %v953_v53, %v953_v53  ;;  %v819_v56 = vadd.f32 %v1753_v51, %v818_v54 }
 0x1a1   : > { %v956_v57 = vmul.f32 %v955_v55, %v953_v53  ;;  %v821_v58 = vmul.f32 %v819_v56, %v819_v56 }
 0x1a3   : > { %v957_v59 = vmul.f32 0.044715, %v956_v57  ;;  %v822_v60 = vmul.f32 %v821_v58, %v819_v56 }
 0x1a5   : > { %v958_v61 = vadd.f32 %v957_v59, %v953_v53  ;;  %v823_v62 = vmul.f32 0.044715, %v822_v60 }
 0x1a7   : > { %v959_v63 = vmul.f32 0.7978846, %v958_v61  ;;  %v824_v1 = vadd.f32 %v823_v62, %v819_v56 }
 0x1a9   : > { %1759 = vtanh.f32 %v959_v63  ;;  %v825_v3 = vmul.f32 0.7978846, %v824_v1 }
 0x1ab   : > { %1761 = vtanh.f32 %v825_v3 }
 0x1af   : > { %v1760_v4 = vpop.eup %1759 }
 0x1b0   : > { %v961_v5 = vadd.f32 1.0, %v1760_v4 }
 0x1b1   : > { %v1762_v6 = vpop.eup %1761 }
 0x1b2   : > { %v962_v7 = vmul.f32 0.5, %v961_v5  ;;  %v827_v8 = vadd.f32 1.0, %v1762_v6 }
 0x1b4   : > { %v963_v9 = vmul.f32 %v962_v7, %v953_v53  ;;  %v828_v10 = vmul.f32 0.5, %v827_v8  ;;  %v739_v8 = vld [vmem:[%s726_s26] sm:$0x1]  ;;  %s1803_s26 = sshra.s32 %s1489_s21, 4  ;;  %s1804_s26 = int_to_ptr.hbm [resolvable:$true] %s1803_s26 }
 0x1b5   : > { %vm1049_vm4 = vcmp.gt.f32.partialorder %v739_v8, 0.0  ;;  %v1253_v8 = vld [vmem:[%s2557_s13 + $0x20] sm:$0xff]  ;;  %s1805_s30 = scalar_lea.hbm %s1804_s26, 8  ;;  %p1810_p0 = scmp.lt.s32.totalorder %s1804_s26, %s2605_s3 }
 0x1b6   : > { %v964_v11 = vmul.f32 %v963_v9, %v2080_v14  ;;  %v829_v12 = vmul.f32 %v828_v10, %v819_v56  ;;  %v1050_v14 = vsel %vm1048_vm3, 1, %v1885_v0  ;;  %v1055_v9 = vsel %vm1049_vm4, 1, %v1885_v0  ;;  %p1806_p11 = scmp.ne.s32.totalorder %s1804_s26, %s1805_s30  ;;  %p1811_p1 = scmp.lt.s32.totalorder %s1809_s20, %s1805_s30 }
 0x1b7   : > { %v1056_v10 = vperm.slane %v1055_v9, 0  ;;  %v1326_v9 = vld [vmem:[%s2559_s15 + $0x20] sm:$0xff] }
 0x1b8   : > { %970 = vrot.lane.b32.xlu1 %v964_v11, %s1886_s4  ;;  %v830_v15 = vmul.f32 %v829_v12, %v2089_v16  ;;  %v967_v18 = vrot.slane %v964_v11, 1  ;;  %v856_v16 = vld [vmem:[%s2553_s9 + $0x58] sm:$0xff]  ;;  %v965_v30 = vrot.slane %v964_v11, 7  ;;  %p1807_p12 = pnand %p1806_p11, %p2031_p5  ;;  %p1812_p2 = por %p1811_p1, %p1810_p0 }
 0x1b9   : > { %986 = vmatpush.msra.mxu3 %v856_v16  ;;  %868 = vmatpush.msra.mxu1 %v856_v16  ;;  %vm1057_vm6 = vcmp.eq.s32.totalorder %v1056_v10, 1  ;;  %v1252_v10 = vld [vmem:[%s2557_s13 + $0x18] sm:$0xff] }
 0x1ba   : > { %836 = vrot.lane.b32.xlu0 %v830_v15, %s1886_s4  ;;  %v968_v20 = vsel %vm920_vm12, %v967_v18, 0.0  ;;  %v833_v21 = vrot.slane %v830_v15, 1  ;;  %v966_v32 = vsel %vm913_vm14, %v965_v30, 0.0  ;;  %v831_v36 = vrot.slane %v830_v15, 7  ;;  %p1808_p13 = pneg %p1807_p12 }
 0x1bb   : > { %974 = vrot.lane.b32.xlu2 %v968_v20, %s1887_s29  ;;  %987 = vmatpush.msra.mxu3 %v855_v19 }
 0x1bc   : > { %v834_v23 = vsel %vm767_vm13, %v833_v21, 0.0  ;;  %869 = vmatpush.msra.mxu1 %v855_v19  ;;  %v832_v39 = vsel %vm760_vm2, %v831_v36, 0.0  ;;  %p1813_p3 = pnand %p1812_p2, %p1808_p13 }
 0x1bd   : > { %988 = vmatpush.msra.mxu3 %v854_v2 }
 0x1be   : > { %870 = vmatpush.msra.mxu1 %v854_v2 }
 0x1c0   : > { %840 = vrot.lane.b32.xlu1 %v834_v23, %s1887_s29 }
 0x1c2   : > { %1012 = vrot.lane.b32.xlu0 %v2091_v17, %s1886_s4  ;;  %v852_v17 = vld [vmem:[%s2553_s9 + $0x38] sm:$0xff] }
 0x1c3   : > { %1017 = vrot.lane.b32.xlu2 %v2078_v13, %s1886_s4  ;;  %v853_v13 = vld [vmem:[%s2553_s9 + $0x40] sm:$0xff] }
 0x1c4   : > { %989 = vmatpush.msra.mxu3 %v853_v13  ;;  %871 = vmatpush.msra.mxu1 %v853_v13 }
 0x1c6   : > { %990 = vmatpush.msra.mxu3 %v852_v17  ;;  %872 = vmatpush.msra.mxu1 %v852_v17 }
 0x1c8   : > { %1052 = vperm.xlu1 %1741, %v1050_v14   ;;  %991 = vmatpush.msra.mxu3 %v851_v22 }
 0x1c9   : > { %873 = vmatpush.msra.mxu1 %v851_v22 }
 0x1ca   : > { %992 = vmatpush.msra.mxu3 %v850_v24 }
 0x1cb   : > { %874 = vmatpush.msra.mxu1 %v850_v24 }
 0x1cc   : > { %993 = vmatpush.msra.mxu3 %v849_v25 }
 0x1cd   : > { %875 = vmatpush.msra.mxu1 %v849_v25 }
 0x1ce   : > { %994 = vmatpush.msra.mxu3 %v848_v26 }
 0x1cf   : > { %876 = vmatpush.msra.mxu1 %v848_v26 }
 0x1d0   : > { %995 = vmatpush.msra.mxu3 %v847_v27 }
 0x1d1   : > { %877 = vmatpush.msra.mxu1 %v847_v27 }
 0x1d2   : > { %996 = vmatpush.msra.mxu3 %v846_v28 }
 0x1d3   : > { %878 = vmatpush.msra.mxu1 %v846_v28 }
 0x1d4   : > { %997 = vmatpush.msra.mxu3 %v845_v29 }
 0x1d5   : > { %879 = vmatpush.msra.mxu1 %v845_v29 }
 0x215   : > { %v975_v33 = vpop.permute.xlu2 %974 }
 0x21d   : > { %v1018_v62 = vpop.permute.xlu2 %1017 }
 0x22a   : > { %v971_v31 = vpop.permute.xlu1 %970 }
 0x22b   : > { %v977_v34 = vsel %vm777_vm15, %v966_v32, %v971_v31 }
 0x22c   : > { %v978_v35 = vsel %vm779_vm0, %v977_v34, %v975_v33  ;;  %v837_v38 = vpop.permute.xlu0 %836 }
 0x22d   : > { %1679 = vmatmul.msk.f32.vlgmr.msra.gmra.mxu3 %vm797_vm1, %v978_v35  ;;  %v843_v40 = vsel %vm777_vm15, %v832_v39, %v837_v38 }
 0x232   : > { %v841_v41 = vpop.permute.xlu1 %840 }
 0x233   : > { %v844_v42 = vsel %vm779_vm0, %v843_v40, %v841_v41 }
 0x234   : > { %1677 = vmatmul.msk.f32.vlgmr.msra.gmra.mxu1 %vm797_vm1, %v844_v42  ;;  %v1013_v3 = vpop.permute.xlu0 %1012  ;;  %v1264_v42 = vld [vmem:[%s2557_s13 + $0x78] sm:$0xff] }
 0x23a   : > { %v1053_v11 = vpop.permute.xlu1 %1052 }
 0x23b   : > { %vm1054_vm5 = vcmp.eq.s32.totalorder %v1053_v11, 1  ;;  %v1325_v11 = vld [vmem:[%s2559_s15 + $0x18] sm:$0xff] }
 0x23c   : > { %vm1058_vm8 = vmand %vm1054_vm5, %vm1057_vm6 }
 0x2b0   : > { %v999_v44 = vpop.f32.mrf.mxu3 }
 0x2b1   : > { %v1000_v45 = vadd.f32 %v1754_v37, %v999_v44  ;;  %v881_v46 = vpop.f32.mrf.mxu1  ;;  %v1263_v44 = vld [vmem:[%s2557_s13 + $0x70] sm:$0xff] }
 0x2b2   : > { %v882_v47 = vadd.f32 %v1754_v37, %v881_v46  ;;  %v1337_v37 = vld [vmem:[%s2559_s15 + $0x78] sm:$0xff]  ;;  %v1262_v46 = vld [vmem:[%s2557_s13 + $0x68] sm:$0xff] }
 0x2b3   : > { %v1002_v48 = vmul.f32 %v1000_v45, %v1000_v45 }
 0x2b4   : > { %v884_v49 = vmul.f32 %v882_v47, %v882_v47 }
 0x2b5   : > { %v1003_v50 = vmul.f32 %v1002_v48, %v1000_v45  ;;  %v1261_v48 = vld [vmem:[%s2557_s13 + $0x60] sm:$0xff] }
 0x2b6   : > { %v885_v43 = vmul.f32 %v884_v49, %v882_v47  ;;  %v1334_v49 = vld [vmem:[%s2559_s15 + $0x60] sm:$0xff] }
 0x2b7   : > { %v1004_v51 = vmul.f32 0.044715, %v1003_v50  ;;  %v1260_v50 = vld [vmem:[%s2557_s13 + $0x58] sm:$0xff] }
 0x2b8   : > { %v886_v52 = vmul.f32 0.044715, %v885_v43  ;;  %v1333_v43 = vld [vmem:[%s2559_s15 + $0x58] sm:$0xff] }
 0x2b9   : > { %v1005_v53 = vadd.f32 %v1004_v51, %v1000_v45  ;;  %v1191_v51 = vld [vmem:[%s2555_s11 + $0x78] sm:$0xff] }
 0x2ba   : > { %v887_v54 = vadd.f32 %v886_v52, %v882_v47  ;;  %v1190_v52 = vld [vmem:[%s2555_s11 + $0x70] sm:$0xff]  ;;  %1196 = vmatpush.msrb.mxu3 %v1191_v51 }
 0x2bb   : > { %v1006_v55 = vmul.f32 0.7978846, %v1005_v53  ;;  %v1259_v53 = vld [vmem:[%s2557_s13 + $0x50] sm:$0xff] }
 0x2bc   : > { %v888_v56 = vmul.f32 0.7978846, %v887_v54  ;;  %v1332_v54 = vld [vmem:[%s2559_s15 + $0x50] sm:$0xff]  ;;  %1197 = vmatpush.msrb.mxu3 %v1190_v52 }
 0x2bd   : > { %1763 = vtanh.f32 %v1006_v55  ;;  %v1189_v55 = vld [vmem:[%s2555_s11 + $0x68] sm:$0xff] }
 0x2be   : > { %1765 = vtanh.f32 %v888_v56  ;;  %v1258_v56 = vld [vmem:[%s2557_s13 + $0x48] sm:$0xff]  ;;  %1198 = vmatpush.msrb.mxu3 %v1189_v55 }
 0x2c3   : > { %v1764_v57 = vpop.eup %1763 }
 0x2c4   : > { %v1766_v58 = vpop.eup %1765  ;;  %v1008_v59 = vadd.f32 1.0, %v1764_v57  ;;  %v1331_v57 = vld [vmem:[%s2559_s15 + $0x48] sm:$0xff] }
 0x2c5   : > { %v890_v60 = vadd.f32 1.0, %v1766_v58  ;;  %v1188_v58 = vld [vmem:[%s2555_s11 + $0x60] sm:$0xff] }
 0x2c6   : > { %v1009_v61 = vmul.f32 0.5, %v1008_v59  ;;  %v1257_v59 = vld [vmem:[%s2557_s13 + $0x40] sm:$0xff]  ;;  %1199 = vmatpush.msrb.mxu3 %v1188_v58 }
 0x2c7   : > { %v891_v63 = vmul.f32 0.5, %v890_v60  ;;  %v1330_v60 = vld [vmem:[%s2559_s15 + $0x40] sm:$0xff] }
 0x2c8   : > { %v1010_v1 = vmul.f32 %v1009_v61, %v1000_v45  ;;  %v1336_v45 = vld [vmem:[%s2559_s15 + $0x70] sm:$0xff]  ;;  %v1187_v61 = vld [vmem:[%s2555_s11 + $0x58] sm:$0xff] }
 0x2c9   : > { %v892_v4 = vmul.f32 %v891_v63, %v882_v47  ;;  %v1335_v47 = vld [vmem:[%s2559_s15 + $0x68] sm:$0xff]  ;;  %v1329_v63 = vld [vmem:[%s2559_s15 + $0x38] sm:$0xff]  ;;  %1200 = vmatpush.msrb.mxu3 %v1187_v61 }
 0x2ca   : > { %v2234_v5 = vsel %vm777_vm15, %v1010_v1, %v1018_v62  ;;  %v1256_v62 = vld [vmem:[%s2557_s13 + $0x38] sm:$0xff]  ;;  %v1255_v1 = vld [vmem:[%s2557_s13 + $0x30] sm:$0xff] }
 0x2cb   : > { %v2237_v6 = vsel %vm777_vm15, %v892_v4, %v1013_v3  ;;  %1680 = vmatpush.xpose.msk.msrb.mxu0 %vm779_vm0, %v2234_v5  ;;  %1104 = vmatpush.msrb.mxu1 %v2234_v5  ;;  %v1328_v3 = vld [vmem:[%s2559_s15 + $0x30] sm:$0xff]  ;;  %v1254_v4 = vld [vmem:[%s2557_s13 + $0x28] sm:$0xff] }
 0x2cc   : > { %1161 = vmatpush.msrb.mxu2 %v2237_v6  ;;  %v1021_v7 = vmul.f32 0.125, %v2237_v6 }
 0x2cd   : > { %1342 = vmatpush.msra.mxu1 %v1337_v37 }
 0x2ce   : > { %1681 = vmatmul.msk.f32.vlgmr.msrb.gmra.mxu0 %vm779_vm0, %v1021_v7  ;;  %v1327_v7 = vld [vmem:[%s2559_s15 + $0x28] sm:$0xff] }
 0x2cf   : > { %1269 = vmatpush.msra.mxu0 %v1264_v42  ;;  %1343 = vmatpush.msra.mxu1 %v1336_v45 }
 0x2d1   : > { %1270 = vmatpush.msra.mxu0 %v1263_v44  ;;  %1344 = vmatpush.msra.mxu1 %v1335_v47 }
 0x2d3   : > { %1271 = vmatpush.msra.mxu0 %v1262_v46  ;;  %1345 = vmatpush.msra.mxu1 %v1334_v49 }
 0x2d5   : > { %1272 = vmatpush.msra.mxu0 %v1261_v48  ;;  %1346 = vmatpush.msra.mxu1 %v1333_v43 }
 0x2d7   : > { %1273 = vmatpush.msra.mxu0 %v1260_v50  ;;  %1347 = vmatpush.msra.mxu1 %v1332_v54 }
 0x2d9   : > { %1274 = vmatpush.msra.mxu0 %v1259_v53  ;;  %1348 = vmatpush.msra.mxu1 %v1331_v57 }
 0x2db   : > { %1275 = vmatpush.msra.mxu0 %v1258_v56  ;;  %1349 = vmatpush.msra.mxu1 %v1330_v60 }
 0x2dd   : > { %1276 = vmatpush.msra.mxu0 %v1257_v59  ;;  %1350 = vmatpush.msra.mxu1 %v1329_v63 }
 0x2df   : > { %1277 = vmatpush.msra.mxu0 %v1256_v62  ;;  %1351 = vmatpush.msra.mxu1 %v1328_v3  ;;  %v1413_v3 = vld [vmem:[%s2561_s17 + $0x50] sm:$0xff] }
 0x2e1   : > { %1278 = vmatpush.msra.mxu0 %v1255_v1  ;;  %1352 = vmatpush.msra.mxu1 %v1327_v7  ;;  %v1414_v1 = vld [vmem:[%s2561_s17 + $0x58] sm:$0xff]  ;;  %v1412_v7 = vld [vmem:[%s2561_s17 + $0x48] sm:$0xff] }
 0x2e2   : > { %1429 = vmatpush.msra.mxu2 %v1414_v1 }
 0x2e3   : > { %1279 = vmatpush.msra.mxu0 %v1254_v4  ;;  %1353 = vmatpush.msra.mxu1 %v1326_v9 }
 0x2e4   : > { %1430 = vmatpush.msra.mxu2 %v1413_v3 }
 0x2e5   : > { %1280 = vmatpush.msra.mxu0 %v1253_v8  ;;  %1354 = vmatpush.msra.mxu1 %v1325_v11 }
 0x2e6   : > { %1431 = vmatpush.msra.mxu2 %v1412_v7 }
 0x2e7   : > { %1281 = vmatpush.msra.mxu0 %v1252_v10  ;;  %v1411_v10 = vld [vmem:[%s2561_s17 + $0x40] sm:$0xff] }
 0x2e8   : > { %1432 = vmatpush.msra.mxu2 %v1411_v10 }
 0x34b   : > { %v1045_v12 = vpop.f32.mrf.mxu0 }
 0x34c   : > { %v1059_v15 = vsel %vm1058_vm8, %v1045_v12, -10000000.0  ;;  %v1251_v12 = vld [vmem:[%s2557_s13 + $0x10] sm:$0xff] }
 0x34d   : > { %v1061_v18 = vsel %vm1060_vm7, %v1059_v15, -inf  ;;  %1282 = vmatpush.msra.mxu0 %v1251_v12 }
 0x34e   : > { %1062 = vmax.xlane.f32.xlu2 %v1061_v18 }
 0x3c1   : > { %v1063_v20 = vpop.xlane.xlu2 %1062 }
 0x3c2   : > { %v1064_v21 = vrot.slane %v1063_v20, 4 }
 0x3c4   : > { %v1065_v23 = vmax.f32 %v1063_v20, %v1064_v21  ;;  %v1186_v20 = vld [vmem:[%s2555_s11 + $0x50] sm:$0xff]  ;;  %v1250_v21 = vld [vmem:[%s2557_s13 + $0x8] sm:$0xff] }
 0x3c5   : > { %1201 = vmatpush.msrb.mxu3 %v1186_v20  ;;  %1283 = vmatpush.msra.mxu0 %v1250_v21  ;;  %v1409_v21 = vld [vmem:[%s2561_s17 + $0x30] sm:$0xff] }
 0x3c6   : > { %v1066_v14 = vrot.slane %v1065_v23, 2 }
 0x3c8   : > { %v1067_v16 = vmax.f32 %v1065_v23, %v1066_v14  ;;  %v1323_v23 = vld [vmem:[%s2559_s15 + $0x8] sm:$0xff] }
 0x3c9   : > { %v1185_v14 = vld [vmem:[%s2555_s11 + $0x48] sm:$0xff] }
 0x3ca   : > { %v1068_v19 = vrot.slane %v1067_v16, 1  ;;  %1202 = vmatpush.msrb.mxu3 %v1185_v14  ;;  %v1407_v14 = vld [vmem:[%s2561_s17 + $0x20] sm:$0xff] }
 0x3cc   : > { %v1069_v2 = vmax.f32 %v1067_v16, %v1068_v19  ;;  %v1249_v16 = vld [vmem:[%s2557_s13] sm:$0xff] }
 0x3cd   : > { %v1322_v19 = vld [vmem:[%s2559_s15] sm:$0xff]  ;;  %1284 = vmatpush.msra.mxu0 %v1249_v16  ;;  %v1406_v16 = vld [vmem:[%s2561_s17 + $0x18] sm:$0xff] }
 0x3ce   : > { %v1070_v13 = vsub.f32 %v1059_v15, %v1069_v2  ;;  %v1324_v15 = vld [vmem:[%s2559_s15 + $0x10] sm:$0xff]  ;;  %v1184_v2 = vld [vmem:[%s2555_s11 + $0x40] sm:$0xff] }
 0x3cf   : > { %1355 = vmatpush.msra.mxu1 %v1324_v15  ;;  %1203 = vmatpush.msrb.mxu3 %v1184_v2  ;;  %v1410_v15 = vld [vmem:[%s2561_s17 + $0x38] sm:$0xff]  ;;  %v1405_v2 = vld [vmem:[%s2561_s17 + $0x10] sm:$0xff] }
 0x3d0   : > { %v1071_v0 = vmul.f32 1.442695, %v1070_v13  ;;  %v1183_v13 = vld [vmem:[%s2555_s11 + $0x38] sm:$0xff]  ;;  %1433 = vmatpush.msra.mxu2 %v1410_v15 }
 0x3d1   : > { %1356 = vmatpush.msra.mxu1 %v1323_v23  ;;  %1204 = vmatpush.msrb.mxu3 %v1183_v13  ;;  %v1404_v13 = vld [vmem:[%s2561_s17 + $0x8] sm:$0xff] }
 0x3d2   : > { %1767 = vpow2.f32 %v1071_v0  ;;  %v1182_v0 = vld [vmem:[%s2555_s11 + $0x30] sm:$0xff]  ;;  %1434 = vmatpush.msra.mxu2 %v1409_v21 }
 0x3d3   : > { %1357 = vmatpush.msra.mxu1 %v1322_v19  ;;  %1205 = vmatpush.msrb.mxu3 %v1182_v0 }
 0x3d8   : > { %v1768_v17 = vpop.eup %1767 }
 0x3d9   : > { %1682 = vmatmul.msk.f32.vlgmr.msrb.gmra.mxu1 %vm1060_vm7, %v1768_v17  ;;  %v1073_v22 = vsel %vm1060_vm7, %v1768_v17, 0.0 }
 0x3da   : > { %1074 = vadd.xlane.f32.xlu1 %v1073_v22  ;;  %v1078_v24 = vrot.slane %v1073_v22, 4 }
 0x3dc   : > { %v1079_v25 = vadd.f32 %v1078_v24, %v1073_v22  ;;  %v1180_v22 = vld [vmem:[%s2555_s11 + $0x20] sm:$0xff]  ;;  %v1179_v24 = vld [vmem:[%s2555_s11 + $0x18] sm:$0xff] }
 0x3de   : > { %v1080_v26 = vrot.slane %v1079_v25, 2 }
 0x3e0   : > { %v1081_v27 = vadd.f32 %v1080_v26, %v1079_v25  ;;  %v1178_v25 = vld [vmem:[%s2555_s11 + $0x10] sm:$0xff]  ;;  %v1177_v26 = vld [vmem:[%s2555_s11 + $0x8] sm:$0xff] }
 0x3e2   : > { %v1082_v28 = vrot.slane %v1081_v27, 1 }
 0x3e4   : > { %v1083_v29 = vadd.f32 %v1082_v28, %v1081_v27  ;;  %v1176_v27 = vld [vmem:[%s2555_s11] sm:$0xff] }
 0x3e6   : > { %v1084_v30 = vadd.f32 1e-20, %v1083_v29 }
 0x3e8   : > { %1769 = vrcp.f32 %v1084_v30 }
 0x3ee   : > { %v1770_v31 = vpop.eup %1769 }
 0x3ef   : > { %v1110_v32 = vmul.f32 %v1770_v31, %v1768_v17  ;;  %v1181_v17 = vld [vmem:[%s2555_s11 + $0x28] sm:$0xff] }
 0x3f0   : > { %1206 = vmatpush.msrb.mxu3 %v1181_v17 }
 0x3f1   : > { %1111 = vxpose.xlu0.b32.start.end [1/1] (short) (narrow) %v1110_v32, 8 }
 0x3f2   : > { %1207 = vmatpush.msrb.mxu3 %v1180_v22  ;;  %v1403_v22 = vld [vmem:[%s2561_s17] sm:$0xff] }
 0x3f4   : > { %1208 = vmatpush.msrb.mxu3 %v1179_v24 }
 0x3f6   : > { %1209 = vmatpush.msrb.mxu3 %v1178_v25 }
 0x3f8   : > { %1210 = vmatpush.msrb.mxu3 %v1177_v26 }
 0x3fa   : > { %1211 = vmatpush.msrb.mxu3 %v1176_v27 }
 0x44d   : > { %v1075_v33 = vpop.xlane.xlu1 %1074 }
 0x44e   : > { %v1076_v34 = vadd.f32 1e-20, %v1075_v33 }
 0x450   : > { %1771 = vrcp.f32 %v1076_v34 }
 0x456   : > { %v1772_v35 = vpop.eup %1771  ;;  %v1106_v36 = vpop.f32.mrf.mxu1 }
 0x457   : > { %v1109_v38 = vmul.f32 %v1772_v35, %v1106_v36 }
 0x459   : > { %v1237_v39 = vsub.f32 %v2237_v6, %v1109_v38  ;;  %v1310_v40 = vmul.f32 %v1109_v38, %v2237_v6  ;;  %1168 = vrot.lane.b32.xlu1 %v1109_v38, %s1887_s29 }
 0x45b   : > { %v1743_v41 = vpack.i.bf16 %v1310_v40, %v1237_v39  ;;  %v2415_v40 = vld [vmem:[%s2558_s14] ss:$0 sm:$0xff] }
 0x45d   : > { %1744 = vrot.lane.b32.xlu2 %v1743_v41, %s1887_s29 }
 0x495   : > { %v1127_v18 = vpop.trf.xlu0 }
 0x496   : > { %1683 = vmatmul.msk.f32.vlgmr.msrb.gmra.mxu2 %vm1060_vm7, %v1127_v18  ;;  %v2450_v18 = vld [vmem:[%s2556_s12] ss:$0 sm:$0xff] }
 0x4b7   : > { %v1745_v28 = vpop.permute.xlu2 %1744 }
 0x4b8   : > { %v1747_v29 = vunpack.i.h.bf16 %v1745_v28  ;;  %v1746_v30 = vunpack.i.l.bf16 %v1745_v28 }
 0x4ba   : > { %v1247_v31 = vsel %vm779_vm0, %v2237_v6, %v1746_v30  ;;  %v1320_v32 = vsel %vm779_vm0, %v2237_v6, %v1747_v29 }
 0x4bb   : > { %1285 = vmatmul.f32.vlgmr.msra.gmra.mxu0 %v1247_v31  ;;  %1358 = vmatmul.f32.vlgmr.msra.gmra.mxu1 %v1320_v32 }
 0x4cb   : > { %v1169_v33 = vpop.permute.xlu1 %1168 }
 0x4cc   : > { %v1174_v34 = vsel %vm779_vm0, %v2237_v6, %v1169_v33  ;;  %v2420_v6 = vld [vmem:[%s2560_s16] ss:$0 sm:$0xff] }
 0x4cd   : > { %1212 = vmatmul.f32.vlgmr.msrb.gmra.mxu3 %v1174_v34 }
 0x519   : > { %v1163_v35 = vpop.f32.mrf.mxu2 }
 0x51a   : > { %v1238_v36 = vsub.f32 %v2234_v5, %v1163_v35  ;;  %v1311_v38 = vmul.f32 %v1163_v35, %v2234_v5  ;;  %1170 = vrot.lane.b32.xlu2 %v1163_v35, %s1887_s29 }
 0x51c   : > { %v1748_v39 = vpack.i.bf16 %v1311_v38, %v1238_v36 }
 0x51e   : > { %1749 = vrot.lane.b32.xlu0 %v1748_v39, %s1887_s29 }
 0x538   : > { %v1286_v41 = vpop.f32.mrf.mxu0  ;;  %v1359_v42 = vpop.f32.mrf.mxu1 }
 0x539   : > { %v1287_v37 = vadd.f32 %v2415_v40, %v1286_v41  ;;  %v1360_v44 = vadd.f32 %v2420_v6, %v1359_v42 }
 0x53b   : > { %v1292_v45 = vmul.f32 %v1287_v37, %v1287_v37  ;;  %v1365_v46 = vmul.f32 %v1360_v44, %v1360_v44 }
 0x53d   : > { %v1294_v47 = vmul.f32 %v1292_v45, %v1287_v37  ;;  %v1367_v48 = vmul.f32 %v1365_v46, %v1360_v44 }
 0x53f   : > { %v1296_v49 = vmul.f32 0.044715, %v1294_v47  ;;  %v1369_v50 = vmul.f32 0.044715, %v1367_v48 }
 0x541   : > { %v1298_v43 = vadd.f32 %v1296_v49, %v1287_v37  ;;  %v1371_v51 = vadd.f32 %v1369_v50, %v1360_v44 }
 0x543   : > { %v1373_v52 = vmul.f32 0.7978846, %v1371_v51  ;;  %v1300_v53 = vmul.f32 0.7978846, %v1298_v43 }
 0x545   : > { %1773 = vtanh.f32 %v1373_v52 }
 0x546   : > { %1775 = vtanh.f32 %v1300_v53 }
 0x54b   : > { %v1774_v54 = vpop.eup %1773 }
 0x54c   : > { %v1776_v55 = vpop.eup %1775  ;;  %v1377_v56 = vadd.f32 1.0, %v1774_v54 }
 0x54d   : > { %v1304_v57 = vadd.f32 1.0, %v1776_v55  ;;  %v1758_v55 = vld [vmem:[%s2562_s18] ss:$0 sm:$0xff] }
 0x54e   : > { %v1379_v58 = vmul.f32 0.5, %v1377_v56 }
 0x54f   : > { %v1306_v59 = vmul.f32 0.5, %v1304_v57 }
 0x550   : > { %v1381_v60 = vmul.f32 %v1379_v58, %v1360_v44  ;;  %v1213_v20 = vpop.f32.mrf.mxu3 }
 0x551   : > { %v1308_v61 = vmul.f32 %v1306_v59, %v1287_v37  ;;  %v1214_v23 = vadd.f32 %v2450_v18, %v1213_v20 }
 0x552   : > { %1393 = vrot.lane.b32.xlu1 %v1381_v60, %s1887_s29 }
 0x553   : > { %1385 = vrot.lane.b32.xlu2 %v1308_v61, %s1886_s4  ;;  %v1219_v19 = vmul.f32 %v1214_v23, %v1214_v23 }
 0x555   : > { %v1221_v0 = vmul.f32 %v1219_v19, %v1214_v23 }
 0x557   : > { %v1223_v17 = vmul.f32 0.044715, %v1221_v0 }
 0x559   : > { %v1225_v24 = vadd.f32 %v1223_v17, %v1214_v23 }
 0x55b   : > { %v1227_v25 = vmul.f32 0.7978846, %v1225_v24 }
 0x55d   : > { %1777 = vtanh.f32 %v1227_v25 }
 0x563   : > { %v1778_v26 = vpop.eup %1777 }
 0x564   : > { %v1231_v27 = vadd.f32 1.0, %v1778_v26 }
 0x566   : > { %v1233_v28 = vmul.f32 0.5, %v1231_v27 }
 0x568   : > { %v1235_v30 = vmul.f32 %v1233_v28, %v1214_v23 }
 0x574   : > { %v1171_v62 = vpop.permute.xlu2 %1170 }
 0x575   : > { %v1175_v63 = vsel %vm779_vm0, %v2234_v5, %v1171_v62 }
 0x576   : > { %1215 = vmatmul.f32.gmra.mxu3 %v1175_v63 }
 0x590   : > { %v1750_v4 = vpop.permute.xlu0 %1749 }
 0x591   : > { %v1752_v8 = vunpack.i.h.bf16 %v1750_v4  ;;  %v1751_v9 = vunpack.i.l.bf16 %v1750_v4 }
 0x593   : > { %v1248_v11 = vsel %vm779_vm0, %v2234_v5, %v1751_v9  ;;  %v1321_v12 = vsel %vm779_vm0, %v2234_v5, %v1752_v8  ;;  %v1408_v5 = vld [vmem:[%s2561_s17 + $0x28] sm:$0xff] }
 0x594   : > { %1288 = vmatmul.f32.gmra.mxu0 %v1248_v11  ;;  %1361 = vmatmul.f32.gmra.mxu1 %v1321_v12 }
 0x595   : > { %1435 = vmatpush.msra.mxu2 %v1408_v5 }
 0x597   : > { %1436 = vmatpush.msra.mxu2 %v1407_v14 }
 0x599   : > { %1437 = vmatpush.msra.mxu2 %v1406_v16 }
 0x59b   : > { %1438 = vmatpush.msra.mxu2 %v1405_v2 }
 0x59d   : > { %1439 = vmatpush.msra.mxu2 %v1404_v13 }
 0x59f   : > { %1440 = vmatpush.msra.mxu2 %v1403_v22 }
 0x5ad   : > { %v1386_v29 = vpop.permute.xlu2 %1385 }
 0x5ae   : > { %v1399_v31 = vsel %vm777_vm15, %v1235_v30, %v1386_v29 }
 0x5c4   : > { %v1394_v32 = vpop.permute.xlu1 %1393 }
 0x5c5   : > { %v1401_v33 = vsel %vm779_vm0, %v1399_v31, %v1394_v32 }
 0x5c6   : > { %1684 = vmatmul.msk.f32.vlgmr.msra.gmra.mxu2 %vm797_vm1, %v1401_v33 }
 0x5f9   : > { %v1216_v7 = vpop.f32.mrf.mxu3 }
 0x5fa   : > { %v1217_v8 = vadd.f32 %v2450_v18, %v1216_v7 }
 0x5fc   : > { %v1220_v9 = vmul.f32 %v1217_v8, %v1217_v8 }
 0x5fe   : > { %v1222_v10 = vmul.f32 %v1220_v9, %v1217_v8 }
 0x600   : > { %v1224_v11 = vmul.f32 0.044715, %v1222_v10 }
 0x602   : > { %v1226_v12 = vadd.f32 %v1224_v11, %v1217_v8 }
 0x604   : > { %v1228_v15 = vmul.f32 0.7978846, %v1226_v12 }
 0x611   : > { %v1289_v34 = vpop.f32.mrf.mxu0  ;;  %v1362_v35 = vpop.f32.mrf.mxu1 }
 0x612   : > { %v1290_v36 = vadd.f32 %v2415_v40, %v1289_v34  ;;  %v1363_v38 = vadd.f32 %v2420_v6, %v1362_v35 }
 0x614   : > { %v1293_v39 = vmul.f32 %v1290_v36, %v1290_v36  ;;  %v1366_v41 = vmul.f32 %v1363_v38, %v1363_v38 }
 0x616   : > { %v1295_v42 = vmul.f32 %v1293_v39, %v1290_v36  ;;  %v1368_v37 = vmul.f32 %v1366_v41, %v1363_v38 }
 0x618   : > { %v1297_v44 = vmul.f32 0.044715, %v1295_v42  ;;  %v1370_v45 = vmul.f32 0.044715, %v1368_v37 }
 0x61a   : > { %v1299_v46 = vadd.f32 %v1297_v44, %v1290_v36  ;;  %v1372_v47 = vadd.f32 %v1370_v45, %v1363_v38 }
 0x61c   : > { %v1374_v48 = vmul.f32 0.7978846, %v1372_v47  ;;  %v1301_v49 = vmul.f32 0.7978846, %v1299_v46 }
 0x61e   : > { %1779 = vtanh.f32 %v1374_v48 }
 0x61f   : > { %1781 = vtanh.f32 %v1301_v49 }
 0x624   : > { %v1780_v50 = vpop.eup %1779 }
 0x625   : > { %v1782_v43 = vpop.eup %1781  ;;  %v1378_v51 = vadd.f32 1.0, %v1780_v50 }
 0x626   : > { %v1305_v52 = vadd.f32 1.0, %v1782_v43 }
 0x627   : > { %v1380_v40 = vmul.f32 0.5, %v1378_v51 }
 0x628   : > { %v1307_v53 = vmul.f32 0.5, %v1305_v52 }
 0x629   : > { %v1382_v6 = vmul.f32 %v1380_v40, %v1363_v38 }
 0x62a   : > { %v1309_v54 = vmul.f32 %v1307_v53, %v1290_v36 }
 0x62b   : > { %1395 = vrot.lane.b32.xlu1 %v1382_v6, %s1887_s29  ;;  %s2576_s29 = sshll.u32 %s2485_s19, 3 }
 0x62c   : > { %1387 = vrot.lane.b32.xlu2 %v1309_v54, %s1886_s4  ;;  %s700_s4 = scalar_lea.vmem [#allocation2], %s2576_s29 }
 0x62d   : > { %s1486_s0 = sshll.u32 %s700_s4, 4  ;;  %s1487_s0 = int_to_ptr.vmem [resolvable:$true] %s1486_s0 }
 0x649   : > { %v1442_v56 = vpop.f32.mrf.mxu2 }
 0x64a   : > { %v1443_v57 = vadd.f32 %v1758_v55, %v1442_v56 }
 0x64c   : > { %v1448_v58 = vmul.f32 %v1443_v57, %v1443_v57 }
 0x64e   : > { %v1450_v59 = vmul.f32 %v1448_v58, %v1443_v57 }
 0x650   : > { %v1452_v60 = vmul.f32 0.044715, %v1450_v59 }
 0x652   : > { %v1454_v61 = vadd.f32 %v1452_v60, %v1443_v57 }
 0x654   : > { %v1456_v62 = vmul.f32 0.7978846, %v1454_v61 }
 0x656   : > { %1783 = vtanh.f32 %v1456_v62 }
 0x657   : > { %1785 = vtanh.f32 %v1228_v15 }
 0x65c   : > { %v1784_v63 = vpop.eup %1783 }
 0x65d   : > { %v1460_v1 = vadd.f32 1.0, %v1784_v63  ;;  %v1786_v20 = vpop.eup %1785 }
 0x65e   : > { %v1232_v21 = vadd.f32 1.0, %v1786_v20 }
 0x65f   : > { %v1462_v3 = vmul.f32 0.5, %v1460_v1 }
 0x660   : > { %v1234_v5 = vmul.f32 0.5, %v1232_v21 }
 0x661   : > { %v1464_v4 = vmul.f32 %v1462_v3, %v1443_v57 }
 0x662   : > { %v1236_v14 = vmul.f32 %v1234_v5, %v1217_v8 }
 0x663   : > { %1466 = vst.msk [vmem:[%s700_s4] sm:$0xff] %vm777_vm15, %v1464_v4 }
 0x686   : > { %v1388_v23 = vpop.permute.xlu2 %1387 }
 0x687   : > { %v1400_v16 = vsel %vm777_vm15, %v1236_v14, %v1388_v23 }
 0x69d   : > { %v1396_v19 = vpop.permute.xlu1 %1395 }
 0x69e   : > { %v1402_v2 = vsel %vm779_vm0, %v1400_v16, %v1396_v19 }
 0x69f   : > { %1685 = vmatmul.msk.f32.gmra.mxu2 %vm797_vm1, %v1402_v2 }
 0x6a0   : > { %1816 = shalt.err (!%p1813_p3)
}
 0x6a1   : > { %1692 = dma.vmem_to_hbm [thread:$0]  (%p2031_p5), %s1487_s0, 128, %s1489_s21, %s1469_s25  }
 0x6a2   : > { %s2606_s6 = sld [smem:[#allocation24_spill]]  ;;  %s2607_s24 = sshll.u32 %s2485_s19, 3 }
 0x6a3   : > { %s707_s2 = scalar_lea.vmem [#allocation4], %s2607_s24  ;;  %s1474_s21 = scalar_lea.sflag [#allocation5], %s2485_s19 }
 0x6a4   : > { %s1500_s28 = sshll.u32 %s707_s2, 4  ;;  %s1501_s28 = int_to_ptr.vmem [resolvable:$true] %s1500_s28 }
 0x6a8   : > { %s1498_s4 = scalar_lea.hbm %s2606_s6, %s1688_s23  ;;  %s1837_s27 = scalar_lea.hbm %s2606_s6, 16 }
 0x6a9   : > { %s1502_s0 = sshll.u32 %s1498_s4, 4  ;;  %s1503_s0 = int_to_ptr.hbm [resolvable:$true] %s1502_s0 }
 0x6aa   : > { %s1831_s25 = sshra.s32 %s1503_s0, 4  ;;  %s1832_s25 = int_to_ptr.hbm [resolvable:$true] %s1831_s25 }
 0x6ab   : > { %s1833_s26 = scalar_lea.hbm %s1832_s25, 8  ;;  %p1838_p9 = scmp.lt.s32.totalorder %s1832_s25, %s2606_s6 }
 0x6ac   : > { %p1834_p4 = scmp.ne.s32.totalorder %s1832_s25, %s1833_s26  ;;  %p1839_p10 = scmp.lt.s32.totalorder %s1837_s27, %s1833_s26 }
 0x6ae   : > { %p1835_p7 = pnand %p1834_p4, %p2031_p5  ;;  %p1840_p11 = por %p1839_p10, %p1838_p9 }
 0x6b0   : > { %p1836_p8 = pneg %p1835_p7 }
 0x6b2   : > { %p1841_p12 = pnand %p1840_p11, %p1836_p8 }
 0x722   : > { %v1445_v18 = vpop.f32.mrf.mxu2 }
 0x723   : > { %v1446_v13 = vadd.f32 %v1758_v55, %v1445_v18 }
 0x725   : > { %v1449_v0 = vmul.f32 %v1446_v13, %v1446_v13 }
 0x727   : > { %v1451_v17 = vmul.f32 %v1449_v0, %v1446_v13 }
 0x729   : > { %v1453_v22 = vmul.f32 0.044715, %v1451_v17 }
 0x72b   : > { %v1455_v24 = vadd.f32 %v1453_v22, %v1446_v13 }
 0x72d   : > { %v1457_v25 = vmul.f32 0.7978846, %v1455_v24 }
 0x72f   : > { %1787 = vtanh.f32 %v1457_v25 }
 0x735   : > { %v1788_v26 = vpop.eup %1787 }
 0x736   : > { %v1461_v27 = vadd.f32 1.0, %v1788_v26 }
 0x738   : > { %v1463_v28 = vmul.f32 0.5, %v1461_v27 }
 0x73a   : > { %v1465_v29 = vmul.f32 %v1463_v28, %v1446_v13 }
 0x73c   : > { %1467 = vst.msk [vmem:[%s707_s2] sm:$0xff] %vm777_vm15, %v1465_v29 }
 0x73d   : > { %1844 = shalt.err (!%p1841_p12)
}
 0x73e   : > { %1693 = dma.vmem_to_hbm [thread:$0]  (%p2031_p5), %s1501_s28, 128, %s1503_s0, %s1474_s21  }
 0x73f PF: > { %s2608_s19 = sld [smem:[#allocation10_spill]] }
 0x740   : > { %s2609_s5 = sld [smem:[#allocation8_spill]] }
 0x745   : > { %p1703_p13 = scmp.ge.s32.totalorder %s2608_s19, 2 }
 0x746   : > { %s1514_s24 = sand.u32 1, %s2609_s5  }
 0x747   : > { %p1697_p0 = pnand %p1703_p13, %p2035_p6  ;;  %s1515_s2 = scalar_lea.sflag [#allocation3], %s1514_s24 }
 0x749   : > { %p1698_p1 = pneg %p1697_p0 }
 0x74b   : > { %1862 = dma.done.wait (%p1698_p1), %s1515_s2, 128  }
 0x74c   : > { %1864 = vsyncadd (%p1698_p1), %s1515_s2, 4294967168  ;;  %s1525_s25 = scalar_lea.sflag [#allocation5], %s1514_s24 }
 0x74d   : > { %1866 = dma.done.wait (%p1698_p1), %s1525_s25, 128  }
 0x74e   : > { %1868 = vsyncadd (%p1698_p1), %s1525_s25, 4294967168  ;;  %s2611_s24 = sld [smem:[#allocation12_spill]]  ;;  %s2614_s1 = smov %s1875_s22 }
 0x74f   : > { %s2612_s26 = sld [smem:[#allocation9_spill]] }
 0x750   : > { %s2613_s23 = sld [smem:[#allocation13_spill]] }
 0x754   : > { %p34_p5 = scmp.ge.s32.totalorder %s2611_s24, 4  }
 0x755   : > { %s2615_s22 = smov %s2612_s26 }
 0x756   :  { %36 = sbr.rel (!%p34_p5) target bundleno = 15 (0xf), region = 166 }
 0x75b   :  { %1531 = vsyncpa [#allocation3], 1 }
 0x75c   :  { %1533 = vsyncpa [#allocation3 + $0x1], 1 }
 0x75d   :  { %1534 = vsyncpa [#allocation5], 1 }
 0x75e   :  { %1536 = vsyncpa [#allocation5 + $0x1], 1 }

</bundles_post_ra>
